<compile_context>
chip_gen: v7x
topology: tpu7x:2x2x1
jax: 0.10.0
libtpu: 0.0.40
codegen_flags: <defaults>
</compile_context>

<pallas_src>
import math
import functools

import jax
import jax.numpy as jnp
from jax.experimental import pallas as pl
from jax.experimental.pallas import tpu as pltpu

MAX_VAL = 1e9      # value used for masked_fill(mask == 0, -MAX_VAL)
LN_EPS = 1e-6      # BERT-pytorch LayerNorm eps (added to std, not var)


def _layer_norm(x, gamma, beta):
    # BERT-pytorch style LayerNorm: gamma * (x - mean) / (std + eps) + beta,
    # std = unbiased standard deviation over the last axis (torch .std default).
    d = x.shape[-1]
    mean = jnp.mean(x, axis=-1, keepdims=True)
    c = x - mean
    var = jnp.sum(c * c, axis=-1, keepdims=True) * (1.0 / (d - 1))
    inv = pl.reciprocal(jnp.sqrt(var) + LN_EPS, approx=True)   # EUP, not a VALU divide
    return c * (inv * gamma) + beta


def _gelu(x):
    # BERT GELU (tanh approximation)
    c = math.sqrt(2.0 / math.pi)
    return 0.5 * x * (1.0 + jnp.tanh(c * (x + 0.044715 * (x * x * x))))


def transformer_block_kernel(
    x_ref, kmask_ref,
    wq_ref, bq_ref, wk_ref, bk_ref, wv_ref, bv_ref, wo_ref, bo_ref,
    ln1_g_ref, ln1_b_ref, ln2_g_ref, ln2_b_ref,
    w1_ref, b1_ref, w2_ref, b2_ref,
    out_ref,
    *, num_heads, d_k,
):
    f32 = jnp.float32
    bf16 = jnp.bfloat16
    Bblk, L, D = x_ref.shape
    H = num_heads
    R = Bblk * L

    x = x_ref[...].reshape(R, D)                  # leading-dim reshape only (free)
    keep = kmask_ref[...] > 0.0                   # (Bblk, 1, L) key-validity

    # ----------------- input sublayer: x + MHA(LayerNorm1(x)) -----------------
    xn = _layer_norm(x, ln1_g_ref[...], ln1_b_ref[...])
    xn_b = xn.astype(bf16)

    # wq / bq are pre-scaled by 1/sqrt(d_k) in the wrapper (trace-time, free).
    q = jnp.dot(xn_b, wq_ref[...], preferred_element_type=f32) + bq_ref[...]
    k = jnp.dot(xn_b, wk_ref[...], preferred_element_type=f32) + bk_ref[...]
    v = jnp.dot(xn_b, wv_ref[...], preferred_element_type=f32) + bv_ref[...]

    # Regroup (R, H*d_k) -> (Bblk*H, L, d_k): static lane slices + major-axis stack,
    # then ONE batched contraction for all (batch, head) pairs.
    def to_heads(t):
        t3 = t.reshape(Bblk, L, D)                                 # free
        parts = [t3[:, :, h * d_k:(h + 1) * d_k] for h in range(H)]
        return jnp.stack(parts, axis=1).reshape(Bblk * H, L, d_k)  # (Z, L, d_k)

    qh = to_heads(q).astype(bf16)
    kh = to_heads(k).astype(bf16)
    vh = to_heads(v).astype(bf16)

    # scores[z, q, k] = sum_d qh[z, q, d] * kh[z, k, d]      (Z = Bblk * H)
    scores = jax.lax.dot_general(qh, kh, (((2,), (2,)), ((0,), (0,))),
                                 preferred_element_type=f32)        # (Z, L, L)

    s4 = scores.reshape(Bblk, H, L, L)                              # free (leading split)
    s4 = jnp.where(keep[:, :, None, :], s4, jnp.float32(-MAX_VAL))  # key-only mask bcast
    m = jnp.max(s4, axis=-1, keepdims=True)
    p = jnp.exp(s4 - m)
    p = p * pl.reciprocal(jnp.sum(p, axis=-1, keepdims=True), approx=True)

    p3 = p.reshape(Bblk * H, L, L).astype(bf16)
    ctx = jax.lax.dot_general(p3, vh, (((2,), (1,)), ((0,), (0,))),
                              preferred_element_type=f32)           # (Z, L, d_k)

    ctx4 = ctx.reshape(Bblk, H, L, d_k)                             # free
    attn = jnp.concatenate([ctx4[:, h] for h in range(H)], axis=-1) # merge heads once
    attn = attn.reshape(R, D)                                       # free

    attn = jnp.dot(attn.astype(bf16), wo_ref[...], preferred_element_type=f32) + bo_ref[...]
    y1 = x + attn                                                   # dropout == identity

    # ----------------- output sublayer: y1 + FFN(LayerNorm2(y1)) -----------------
    z = _layer_norm(y1, ln2_g_ref[...], ln2_b_ref[...])
    hdn = _gelu(jnp.dot(z.astype(bf16), w1_ref[...], preferred_element_type=f32) + b1_ref[...])
    ffn = jnp.dot(hdn.astype(bf16), w2_ref[...], preferred_element_type=f32) + b2_ref[...]

    out_ref[...] = (y1 + ffn).reshape(Bblk, L, D)                   # free (leading split)


def _pick_block_batch(B, L, target_rows=512):
    # Largest divisor of B such that Bblk * L stays near the target GEMM row count.
    cap = max(1, target_rows // max(1, L))
    best = 1
    for cand in range(1, B + 1):
        if B % cand == 0 and cand <= cap:
            best = cand
    return best


def transformer_block(x, key_valid, params, num_heads, *, target_rows=512):
    B, L, D = x.shape
    assert D % num_heads == 0
    d_k = D // num_heads
    FF = params["w1"].shape[1]

    Bblk = _pick_block_batch(B, L, target_rows)
    grid = (B // Bblk,)

    f32, bf16 = jnp.float32, jnp.bfloat16
    scale = 1.0 / math.sqrt(d_k)

    # bf16 MXU operands (f32 accumulation inside the kernel); fold 1/sqrt(d_k) into wq/bq.
    wq = (params["wq"] * scale).astype(bf16)
    bq = (params["bq"] * scale).astype(f32)
    wk = params["wk"].astype(bf16); bk = params["bk"].astype(f32)
    wv = params["wv"].astype(bf16); bv = params["bv"].astype(f32)
    wo = params["wo"].astype(bf16); bo = params["bo"].astype(f32)
    w1 = params["w1"].astype(bf16); b1 = params["b1"].astype(f32)
    w2 = params["w2"].astype(bf16); b2 = params["b2"].astype(f32)
    ln1_g = params["ln1_g"].astype(f32); ln1_b = params["ln1_b"].astype(f32)
    ln2_g = params["ln2_g"].astype(f32); ln2_b = params["ln2_b"].astype(f32)

    # Key-only validity mask (B, 1, L) instead of a (B, 1, L, L) float mask in HBM.
    kmask = key_valid.astype(f32).reshape(B, 1, L)

    def rep_spec(shape):  # whole-array (weight) block, same for every grid step
        nd = len(shape)
        return pl.BlockSpec(shape, lambda b, _nd=nd: (0,) * _nd)

    in_specs = [
        pl.BlockSpec((Bblk, L, D), lambda b: (b, 0, 0)),     # x
        pl.BlockSpec((Bblk, 1, L), lambda b: (b, 0, 0)),     # key-validity mask
        rep_spec((D, D)), rep_spec((1, D)),                  # wq, bq (pre-scaled)
        rep_spec((D, D)), rep_spec((1, D)),                  # wk, bk
        rep_spec((D, D)), rep_spec((1, D)),                  # wv, bv
        rep_spec((D, D)), rep_spec((1, D)),                  # wo, bo
        rep_spec((1, D)), rep_spec((1, D)),                  # ln1 gamma, beta
        rep_spec((1, D)), rep_spec((1, D)),                  # ln2 gamma, beta
        rep_spec((D, FF)), rep_spec((1, FF)),                # w1, b1
        rep_spec((FF, D)), rep_spec((1, D)),                 # w2, b2
    ]
    out_specs = pl.BlockSpec((Bblk, L, D), lambda b: (b, 0, 0))

    # Advisory cost estimate for the XLA scheduler.
    flops = int(2 * B * L * D * D * 4                 # q/k/v/out projections
                + 4 * B * num_heads * L * L * d_k     # scores + p@v
                + 4 * B * L * D * FF)                 # FFN (two GEMMs)
    transcendentals = int(B * num_heads * L * L + B * L * FF + 4 * B * L)
    bytes_accessed = int(2 * B * L * D * 4 + B * L * 4
                         + (4 * D * D + 2 * D * FF) * 2   # bf16 weights
                         + (9 * D + FF) * 4)              # biases + LN params

    kernel = functools.partial(transformer_block_kernel,
                               num_heads=num_heads, d_k=d_k)

    return pl.pallas_call(
        kernel,
        out_shape=jax.ShapeDtypeStruct((B, L, D), f32),
        grid_spec=pltpu.PrefetchScalarGridSpec(
            num_scalar_prefetch=0,
            grid=grid,
            in_specs=in_specs,
            out_specs=out_specs,
        ),
        compiler_params=pltpu.CompilerParams(
            dimension_semantics=("parallel",),
            # Explicit VMEM budget (safe on v5e/v6e/v7x); at production D/FF either keep
            # bf16 weights resident within this limit or add an FF tiling grid axis.
            vmem_limit_bytes=32 * 1024 * 1024,
        ),
        cost_estimate=pl.CostEstimate(flops=flops,
                                      transcendentals=transcendentals,
                                      bytes_accessed=bytes_accessed),
    )(
        x, kmask,
        wq, bq, wk, bk, wv, bv, wo, bo,
        ln1_g, ln1_b, ln2_g, ln2_b,
        w1, b1, w2, b2,
    )


def transformer_block_ref(x, key_valid, params, num_heads):
    # Pure-JAX f32 reference matching the PyTorch module (eval mode).
    B, L, D = x.shape
    d_k = D // num_heads

    def ln(v, g, b):
        mean = jnp.mean(v, axis=-1, keepdims=True)
        var = jnp.sum((v - mean) ** 2, axis=-1, keepdims=True) / (D - 1)
        return g * (v - mean) / (jnp.sqrt(var) + LN_EPS) + b

    def gelu(v):
        c = math.sqrt(2.0 / math.pi)
        return 0.5 * v * (1.0 + jnp.tanh(c * (v + 0.044715 * v ** 3)))

    xn = ln(x, params["ln1_g"], params["ln1_b"])
    q = xn @ params["wq"] + params["bq"]
    k = xn @ params["wk"] + params["bk"]
    v = xn @ params["wv"] + params["bv"]

    def heads(t):
        return t.reshape(B, L, num_heads, d_k).transpose(0, 2, 1, 3)

    qh, kh, vh = heads(q), heads(k), heads(v)
    scores = jnp.einsum('bhqd,bhkd->bhqk', qh, kh) / math.sqrt(d_k)
    keep = key_valid[:, None, None, :] > 0
    scores = jnp.where(keep, scores, -MAX_VAL)
    p = jax.nn.softmax(scores, axis=-1)
    ctx = jnp.einsum('bhqk,bhkd->bhqd', p, vh)
    attn = ctx.transpose(0, 2, 1, 3).reshape(B, L, D)
    attn = attn @ params["wo"] + params["bo"]
    y1 = x + attn
    z = ln(y1, params["ln2_g"], params["ln2_b"])
    ffn = gelu(z @ params["w1"] + params["b1"]) @ params["w2"] + params["b2"]
    return y1 + ffn


def make_params(key, hidden, ff_hidden):
    ks = jax.random.split(key, 12)
    s = 0.05
    D, FF = hidden, ff_hidden
    return {
        "wq": jax.random.normal(ks[0], (D, D), jnp.float32) * s,
        "bq": jax.random.normal(ks[1], (1, D), jnp.float32) * s,
        "wk": jax.random.normal(ks[2], (D, D), jnp.float32) * s,
        "bk": jax.random.normal(ks[3], (1, D), jnp.float32) * s,
        "wv": jax.random.normal(ks[4], (D, D), jnp.float32) * s,
        "bv": jax.random.normal(ks[5], (1, D), jnp.float32) * s,
        "wo": jax.random.normal(ks[6], (D, D), jnp.float32) * s,
        "bo": jax.random.normal(ks[7], (1, D), jnp.float32) * s,
        "ln1_g": jnp.ones((1, D), jnp.float32),
        "ln1_b": jnp.zeros((1, D), jnp.float32),
        "ln2_g": jnp.ones((1, D), jnp.float32),
        "ln2_b": jnp.zeros((1, D), jnp.float32),
        "w1": jax.random.normal(ks[8], (D, FF), jnp.float32) * s,
        "b1": jax.random.normal(ks[9], (1, FF), jnp.float32) * s,
        "w2": jax.random.normal(ks[10], (FF, D), jnp.float32) * s,
        "b2": jax.random.normal(ks[11], (1, D), jnp.float32) * s,
    }


if __name__ == "__main__":
    # Small shapes consistent with the module: hidden=32, attn_heads=4 (d_k=8),
    # feed_forward_hidden=128, batch=2, seq=8.
    B, L, D, H, FF = 2, 8, 32, 4, 128

    key = jax.random.PRNGKey(0)
    k_x, k_p = jax.random.split(key)

    x = jax.random.normal(k_x, (B, L, D), jnp.float32)

    # BERT4Rec-style key mask: sequence 0 has 8 valid tokens, sequence 1 has 6.
    lengths = jnp.array([8, 6], dtype=jnp.int32)
    key_valid = (jnp.arange(L)[None, :] < lengths[:, None]).astype(jnp.float32)  # (B, L)

    params = make_params(k_p, D, FF)

    out = transformer_block(x, key_valid, params, num_heads=H)
    out = jax.block_until_ready(out)

    ref = transformer_block_ref(x, key_valid, params, num_heads=H)
    assert out.shape == (B, L, D)
    assert bool(jnp.all(jnp.isfinite(out)))
    max_err = float(jnp.max(jnp.abs(out - ref)))
    assert max_err < 5e-2, f"max abs error vs reference too large: {max_err}"

    print("KERNEL_OK")
</pallas_src>

<mosaic_0001>
module attributes {stable_mosaic.version = 11 : i64} {
  func.func @transformer_block_kernel(%arg0: i32, %arg1: memref<2x8x32xf32, #tpu.memory_space<vmem>>, %arg2: memref<2x1x8xf32, #tpu.memory_space<vmem>>, %arg3: memref<32x32xbf16, #tpu.memory_space<vmem>>, %arg4: memref<1x32xf32, #tpu.memory_space<vmem>>, %arg5: memref<32x32xbf16, #tpu.memory_space<vmem>>, %arg6: memref<1x32xf32, #tpu.memory_space<vmem>>, %arg7: memref<32x32xbf16, #tpu.memory_space<vmem>>, %arg8: memref<1x32xf32, #tpu.memory_space<vmem>>, %arg9: memref<32x32xbf16, #tpu.memory_space<vmem>>, %arg10: memref<1x32xf32, #tpu.memory_space<vmem>>, %arg11: memref<1x32xf32, #tpu.memory_space<vmem>>, %arg12: memref<1x32xf32, #tpu.memory_space<vmem>>, %arg13: memref<1x32xf32, #tpu.memory_space<vmem>>, %arg14: memref<1x32xf32, #tpu.memory_space<vmem>>, %arg15: memref<32x128xbf16, #tpu.memory_space<vmem>>, %arg16: memref<1x128xf32, #tpu.memory_space<vmem>>, %arg17: memref<128x32xbf16, #tpu.memory_space<vmem>>, %arg18: memref<1x32xf32, #tpu.memory_space<vmem>>, %arg19: memref<2x8x32xf32, #tpu.memory_space<vmem>>) attributes {dimension_semantics = [#tpu.dimension_semantics<parallel>], iteration_bounds = array<i64: 1>, scalar_prefetch = 0 : i64, scratch_operands = 0 : i64, tpu.core_type = #tpu.core_type<tc>, window_params = [{transform_indices = @transform_0, window_bounds = array<i64: 2, 8, 32>}, {transform_indices = @transform_1, window_bounds = array<i64: 2, 1, 8>}, {pipeline_mode = #tpu.pipeline_mode<synchronous>, transform_indices = @transform_2, window_bounds = array<i64: 32, 32>}, {pipeline_mode = #tpu.pipeline_mode<synchronous>, transform_indices = @transform_3, window_bounds = array<i64: 1, 32>}, {pipeline_mode = #tpu.pipeline_mode<synchronous>, transform_indices = @transform_4, window_bounds = array<i64: 32, 32>}, {pipeline_mode = #tpu.pipeline_mode<synchronous>, transform_indices = @transform_5, window_bounds = array<i64: 1, 32>}, {pipeline_mode = #tpu.pipeline_mode<synchronous>, transform_indices = @transform_6, window_bounds = array<i64: 32, 32>}, {pipeline_mode = #tpu.pipeline_mode<synchronous>, transform_indices = @transform_7, window_bounds = array<i64: 1, 32>}, {pipeline_mode = #tpu.pipeline_mode<synchronous>, transform_indices = @transform_8, window_bounds = array<i64: 32, 32>}, {pipeline_mode = #tpu.pipeline_mode<synchronous>, transform_indices = @transform_9, window_bounds = array<i64: 1, 32>}, {pipeline_mode = #tpu.pipeline_mode<synchronous>, transform_indices = @transform_10, window_bounds = array<i64: 1, 32>}, {pipeline_mode = #tpu.pipeline_mode<synchronous>, transform_indices = @transform_11, window_bounds = array<i64: 1, 32>}, {pipeline_mode = #tpu.pipeline_mode<synchronous>, transform_indices = @transform_12, window_bounds = array<i64: 1, 32>}, {pipeline_mode = #tpu.pipeline_mode<synchronous>, transform_indices = @transform_13, window_bounds = array<i64: 1, 32>}, {pipeline_mode = #tpu.pipeline_mode<synchronous>, transform_indices = @transform_14, window_bounds = array<i64: 32, 128>}, {pipeline_mode = #tpu.pipeline_mode<synchronous>, transform_indices = @transform_15, window_bounds = array<i64: 1, 128>}, {pipeline_mode = #tpu.pipeline_mode<synchronous>, transform_indices = @transform_16, window_bounds = array<i64: 128, 32>}, {pipeline_mode = #tpu.pipeline_mode<synchronous>, transform_indices = @transform_17, window_bounds = array<i64: 1, 32>}, {transform_indices = @transform_18, window_bounds = array<i64: 2, 8, 32>}]} {
    %c0 = arith.constant 0 : index
    %c0_0 = arith.constant 0 : index
    %c0_1 = arith.constant 0 : index
    %0 = vector.load %arg1[%c0, %c0_0, %c0_1] : memref<2x8x32xf32, #tpu.memory_space<vmem>>, vector<2x8x32xf32>
    %1 = vector.shape_cast %0 : vector<2x8x32xf32> to vector<16x32xf32>
    %c0_2 = arith.constant 0 : index
    %c0_3 = arith.constant 0 : index
    %c0_4 = arith.constant 0 : index
    %2 = vector.load %arg2[%c0_2, %c0_3, %c0_4] : memref<2x1x8xf32, #tpu.memory_space<vmem>>, vector<2x1x8xf32>
    %cst = arith.constant 0.000000e+00 : f32
    %3 = vector.broadcast %cst : f32 to vector<2x1x8xf32>
    %4 = arith.cmpf ogt, %2, %3 : vector<2x1x8xf32>
    %c0_5 = arith.constant 0 : index
    %c0_6 = arith.constant 0 : index
    %5 = vector.load %arg11[%c0_5, %c0_6] : memref<1x32xf32, #tpu.memory_space<vmem>>, vector<1x32xf32>
    %c0_7 = arith.constant 0 : index
    %c0_8 = arith.constant 0 : index
    %6 = vector.load %arg12[%c0_7, %c0_8] : memref<1x32xf32, #tpu.memory_space<vmem>>, vector<1x32xf32>
    %cst_9 = arith.constant dense<0.000000e+00> : vector<16xf32>
    %7 = vector.multi_reduction <add>, %1, %cst_9 [1] : vector<16x32xf32> to vector<16xf32>
    %8 = vector.shape_cast %7 : vector<16xf32> to vector<16x1xf32>
    %cst_10 = arith.constant 3.200000e+01 : f32
    %9 = vector.broadcast %cst_10 : f32 to vector<16x1xf32>
    %10 = arith.divf %8, %9 : vector<16x1xf32>
    %11 = vector.broadcast %10 : vector<16x1xf32> to vector<16x32xf32>
    %12 = arith.subf %1, %11 : vector<16x32xf32>
    %13 = arith.mulf %12, %12 : vector<16x32xf32>
    %cst_11 = arith.constant dense<0.000000e+00> : vector<16xf32>
    %14 = vector.multi_reduction <add>, %13, %cst_11 [1] : vector<16x32xf32> to vector<16xf32>
    %15 = vector.shape_cast %14 : vector<16xf32> to vector<16x1xf32>
    %cst_12 = arith.constant 0.0322580636 : f32
    %16 = vector.broadcast %cst_12 : f32 to vector<16x1xf32>
    %17 = arith.mulf %15, %16 : vector<16x1xf32>
    %18 = math.sqrt %17 : vector<16x1xf32>
    %cst_13 = arith.constant 9.99999997E-7 : f32
    %19 = vector.broadcast %cst_13 : f32 to vector<16x1xf32>
    %20 = arith.addf %18, %19 : vector<16x1xf32>
    %21 = tpu.reciprocal %20 {approx = true} : vector<16x1xf32> -> vector<16x1xf32>
    %22 = vector.broadcast %21 : vector<16x1xf32> to vector<16x32xf32>
    %23 = vector.broadcast %5 : vector<1x32xf32> to vector<16x32xf32>
    %24 = arith.mulf %22, %23 : vector<16x32xf32>
    %25 = arith.mulf %12, %24 : vector<16x32xf32>
    %26 = vector.broadcast %6 : vector<1x32xf32> to vector<16x32xf32>
    %27 = arith.addf %25, %26 : vector<16x32xf32>
    %28 = arith.truncf %27 : vector<16x32xf32> to vector<16x32xbf16>
    %c0_14 = arith.constant 0 : index
    %c0_15 = arith.constant 0 : index
    %29 = vector.load %arg3[%c0_14, %c0_15] : memref<32x32xbf16, #tpu.memory_space<vmem>>, vector<32x32xbf16>
    %cst_16 = arith.constant dense<0.000000e+00> : vector<16x32xf32>
    %30 = tpu.matmul %28, %29, %cst_16 {dimension_numbers = #tpu.dot_dimension_numbers<[1], [0], [0], [1], [0, 0, 1, 1], [], []>} : vector<16x32xbf16>, vector<32x32xbf16>, vector<16x32xf32> -> vector<16x32xf32>
    %c0_17 = arith.constant 0 : index
    %c0_18 = arith.constant 0 : index
    %31 = vector.load %arg4[%c0_17, %c0_18] : memref<1x32xf32, #tpu.memory_space<vmem>>, vector<1x32xf32>
    %32 = vector.broadcast %31 : vector<1x32xf32> to vector<16x32xf32>
    %33 = arith.addf %30, %32 : vector<16x32xf32>
    %c0_19 = arith.constant 0 : index
    %c0_20 = arith.constant 0 : index
    %34 = vector.load %arg5[%c0_19, %c0_20] : memref<32x32xbf16, #tpu.memory_space<vmem>>, vector<32x32xbf16>
    %cst_21 = arith.constant dense<0.000000e+00> : vector<16x32xf32>
    %35 = tpu.matmul %28, %34, %cst_21 {dimension_numbers = #tpu.dot_dimension_numbers<[1], [0], [0], [1], [0, 0, 1, 1], [], []>} : vector<16x32xbf16>, vector<32x32xbf16>, vector<16x32xf32> -> vector<16x32xf32>
    %c0_22 = arith.constant 0 : index
    %c0_23 = arith.constant 0 : index
    %36 = vector.load %arg6[%c0_22, %c0_23] : memref<1x32xf32, #tpu.memory_space<vmem>>, vector<1x32xf32>
    %37 = vector.broadcast %36 : vector<1x32xf32> to vector<16x32xf32>
    %38 = arith.addf %35, %37 : vector<16x32xf32>
    %c0_24 = arith.constant 0 : index
    %c0_25 = arith.constant 0 : index
    %39 = vector.load %arg7[%c0_24, %c0_25] : memref<32x32xbf16, #tpu.memory_space<vmem>>, vector<32x32xbf16>
    %cst_26 = arith.constant dense<0.000000e+00> : vector<16x32xf32>
    %40 = tpu.matmul %28, %39, %cst_26 {dimension_numbers = #tpu.dot_dimension_numbers<[1], [0], [0], [1], [0, 0, 1, 1], [], []>} : vector<16x32xbf16>, vector<32x32xbf16>, vector<16x32xf32> -> vector<16x32xf32>
    %c0_27 = arith.constant 0 : index
    %c0_28 = arith.constant 0 : index
    %41 = vector.load %arg8[%c0_27, %c0_28] : memref<1x32xf32, #tpu.memory_space<vmem>>, vector<1x32xf32>
    %42 = vector.broadcast %41 : vector<1x32xf32> to vector<16x32xf32>
    %43 = arith.addf %40, %42 : vector<16x32xf32>
    %44 = vector.shape_cast %33 : vector<16x32xf32> to vector<2x8x32xf32>
    %45 = vector.extract_strided_slice %44 {offsets = [0, 0, 0], sizes = [2, 8, 8], strides = [1, 1, 1]} : vector<2x8x32xf32> to vector<2x8x8xf32>
    %46 = vector.extract_strided_slice %44 {offsets = [0, 0, 8], sizes = [2, 8, 8], strides = [1, 1, 1]} : vector<2x8x32xf32> to vector<2x8x8xf32>
    %47 = vector.extract_strided_slice %44 {offsets = [0, 0, 16], sizes = [2, 8, 8], strides = [1, 1, 1]} : vector<2x8x32xf32> to vector<2x8x8xf32>
    %48 = vector.extract_strided_slice %44 {offsets = [0, 0, 24], sizes = [2, 8, 8], strides = [1, 1, 1]} : vector<2x8x32xf32> to vector<2x8x8xf32>
    %49 = vector.shape_cast %45 : vector<2x8x8xf32> to vector<2x1x8x8xf32>
    %50 = vector.shape_cast %46 : vector<2x8x8xf32> to vector<2x1x8x8xf32>
    %51 = vector.shape_cast %47 : vector<2x8x8xf32> to vector<2x1x8x8xf32>
    %52 = vector.shape_cast %48 : vector<2x8x8xf32> to vector<2x1x8x8xf32>
    %53 = tpu.concatenate %49, %50, %51, %52 in 1 : vector<2x1x8x8xf32>, vector<2x1x8x8xf32>, vector<2x1x8x8xf32>, vector<2x1x8x8xf32> -> vector<2x4x8x8xf32>
    %54 = vector.shape_cast %53 : vector<2x4x8x8xf32> to vector<8x8x8xf32>
    %55 = arith.truncf %54 : vector<8x8x8xf32> to vector<8x8x8xbf16>
    %56 = vector.shape_cast %38 : vector<16x32xf32> to vector<2x8x32xf32>
    %57 = vector.extract_strided_slice %56 {offsets = [0, 0, 0], sizes = [2, 8, 8], strides = [1, 1, 1]} : vector<2x8x32xf32> to vector<2x8x8xf32>
    %58 = vector.extract_strided_slice %56 {offsets = [0, 0, 8], sizes = [2, 8, 8], strides = [1, 1, 1]} : vector<2x8x32xf32> to vector<2x8x8xf32>
    %59 = vector.extract_strided_slice %56 {offsets = [0, 0, 16], sizes = [2, 8, 8], strides = [1, 1, 1]} : vector<2x8x32xf32> to vector<2x8x8xf32>
    %60 = vector.extract_strided_slice %56 {offsets = [0, 0, 24], sizes = [2, 8, 8], strides = [1, 1, 1]} : vector<2x8x32xf32> to vector<2x8x8xf32>
    %61 = vector.shape_cast %57 : vector<2x8x8xf32> to vector<2x1x8x8xf32>
    %62 = vector.shape_cast %58 : vector<2x8x8xf32> to vector<2x1x8x8xf32>
    %63 = vector.shape_cast %59 : vector<2x8x8xf32> to vector<2x1x8x8xf32>
    %64 = vector.shape_cast %60 : vector<2x8x8xf32> to vector<2x1x8x8xf32>
    %65 = tpu.concatenate %61, %62, %63, %64 in 1 : vector<2x1x8x8xf32>, vector<2x1x8x8xf32>, vector<2x1x8x8xf32>, vector<2x1x8x8xf32> -> vector<2x4x8x8xf32>
    %66 = vector.shape_cast %65 : vector<2x4x8x8xf32> to vector<8x8x8xf32>
    %67 = arith.truncf %66 : vector<8x8x8xf32> to vector<8x8x8xbf16>
    %68 = vector.shape_cast %43 : vector<16x32xf32> to vector<2x8x32xf32>
    %69 = vector.extract_strided_slice %68 {offsets = [0, 0, 0], sizes = [2, 8, 8], strides = [1, 1, 1]} : vector<2x8x32xf32> to vector<2x8x8xf32>
    %70 = vector.extract_strided_slice %68 {offsets = [0, 0, 8], sizes = [2, 8, 8], strides = [1, 1, 1]} : vector<2x8x32xf32> to vector<2x8x8xf32>
    %71 = vector.extract_strided_slice %68 {offsets = [0, 0, 16], sizes = [2, 8, 8], strides = [1, 1, 1]} : vector<2x8x32xf32> to vector<2x8x8xf32>
    %72 = vector.extract_strided_slice %68 {offsets = [0, 0, 24], sizes = [2, 8, 8], strides = [1, 1, 1]} : vector<2x8x32xf32> to vector<2x8x8xf32>
    %73 = vector.shape_cast %69 : vector<2x8x8xf32> to vector<2x1x8x8xf32>
    %74 = vector.shape_cast %70 : vector<2x8x8xf32> to vector<2x1x8x8xf32>
    %75 = vector.shape_cast %71 : vector<2x8x8xf32> to vector<2x1x8x8xf32>
    %76 = vector.shape_cast %72 : vector<2x8x8xf32> to vector<2x1x8x8xf32>
    %77 = tpu.concatenate %73, %74, %75, %76 in 1 : vector<2x1x8x8xf32>, vector<2x1x8x8xf32>, vector<2x1x8x8xf32>, vector<2x1x8x8xf32> -> vector<2x4x8x8xf32>
    %78 = vector.shape_cast %77 : vector<2x4x8x8xf32> to vector<8x8x8xf32>
    %79 = arith.truncf %78 : vector<8x8x8xf32> to vector<8x8x8xbf16>
    %cst_29 = arith.constant dense<0.000000e+00> : vector<8x8x8xf32>
    %80 = tpu.matmul %55, %67, %cst_29 {dimension_numbers = #tpu.dot_dimension_numbers<[2], [2], [1], [1], [0, 0, 0, 1, 1, 1], [0], [0]>} : vector<8x8x8xbf16>, vector<8x8x8xbf16>, vector<8x8x8xf32> -> vector<8x8x8xf32>
    %81 = vector.shape_cast %80 : vector<8x8x8xf32> to vector<2x4x8x8xf32>
    %82 = vector.shape_cast %4 : vector<2x1x8xi1> to vector<2x1x1x8xi1>
    %cst_30 = arith.constant -1.000000e+09 : f32
    %83 = vector.shape_cast %82 : vector<2x1x1x8xi1> to vector<2x1x1x8xi1>
    %84 = vector.broadcast %83 : vector<2x1x1x8xi1> to vector<2x4x8x8xi1>
    %85 = vector.broadcast %cst_30 : f32 to vector<2x4x8x8xf32>
    %86 = arith.select %84, %81, %85 : vector<2x4x8x8xi1>, vector<2x4x8x8xf32>
    %cst_31 = arith.constant dense<0xFF800000> : vector<2x4x8xf32>
    %87 = vector.multi_reduction <maximumf>, %86, %cst_31 [3] : vector<2x4x8x8xf32> to vector<2x4x8xf32>
    %88 = vector.shape_cast %87 : vector<2x4x8xf32> to vector<2x4x8x1xf32>
    %89 = vector.broadcast %88 : vector<2x4x8x1xf32> to vector<2x4x8x8xf32>
    %90 = arith.subf %86, %89 : vector<2x4x8x8xf32>
    %91 = math.exp %90 : vector<2x4x8x8xf32>
    %cst_32 = arith.constant dense<0.000000e+00> : vector<2x4x8xf32>
    %92 = vector.multi_reduction <add>, %91, %cst_32 [3] : vector<2x4x8x8xf32> to vector<2x4x8xf32>
    %93 = vector.shape_cast %92 : vector<2x4x8xf32> to vector<2x4x8x1xf32>
    %94 = tpu.reciprocal %93 {approx = true} : vector<2x4x8x1xf32> -> vector<2x4x8x1xf32>
    %95 = vector.broadcast %94 : vector<2x4x8x1xf32> to vector<2x4x8x8xf32>
    %96 = arith.mulf %91, %95 : vector<2x4x8x8xf32>
    %97 = vector.shape_cast %96 : vector<2x4x8x8xf32> to vector<8x8x8xf32>
    %98 = arith.truncf %97 : vector<8x8x8xf32> to vector<8x8x8xbf16>
    %cst_33 = arith.constant dense<0.000000e+00> : vector<8x8x8xf32>
    %99 = tpu.matmul %98, %79, %cst_33 {dimension_numbers = #tpu.dot_dimension_numbers<[2], [1], [1], [2], [0, 0, 0, 1, 1, 2], [0], [0]>} : vector<8x8x8xbf16>, vector<8x8x8xbf16>, vector<8x8x8xf32> -> vector<8x8x8xf32>
    %100 = vector.shape_cast %99 : vector<8x8x8xf32> to vector<2x4x8x8xf32>
    %101 = vector.extract_strided_slice %100 {offsets = [0, 0, 0, 0], sizes = [2, 1, 8, 8], strides = [1, 1, 1, 1]} : vector<2x4x8x8xf32> to vector<2x1x8x8xf32>
    %102 = vector.shape_cast %101 : vector<2x1x8x8xf32> to vector<2x8x8xf32>
    %103 = vector.extract_strided_slice %100 {offsets = [0, 1, 0, 0], sizes = [2, 1, 8, 8], strides = [1, 1, 1, 1]} : vector<2x4x8x8xf32> to vector<2x1x8x8xf32>
    %104 = vector.shape_cast %103 : vector<2x1x8x8xf32> to vector<2x8x8xf32>
    %105 = vector.extract_strided_slice %100 {offsets = [0, 2, 0, 0], sizes = [2, 1, 8, 8], strides = [1, 1, 1, 1]} : vector<2x4x8x8xf32> to vector<2x1x8x8xf32>
    %106 = vector.shape_cast %105 : vector<2x1x8x8xf32> to vector<2x8x8xf32>
    %107 = vector.extract_strided_slice %100 {offsets = [0, 3, 0, 0], sizes = [2, 1, 8, 8], strides = [1, 1, 1, 1]} : vector<2x4x8x8xf32> to vector<2x1x8x8xf32>
    %108 = vector.shape_cast %107 : vector<2x1x8x8xf32> to vector<2x8x8xf32>
    %109 = tpu.concatenate %102, %104, %106, %108 in 2 : vector<2x8x8xf32>, vector<2x8x8xf32>, vector<2x8x8xf32>, vector<2x8x8xf32> -> vector<2x8x32xf32>
    %110 = vector.shape_cast %109 : vector<2x8x32xf32> to vector<16x32xf32>
    %111 = arith.truncf %110 : vector<16x32xf32> to vector<16x32xbf16>
    %c0_34 = arith.constant 0 : index
    %c0_35 = arith.constant 0 : index
    %112 = vector.load %arg9[%c0_34, %c0_35] : memref<32x32xbf16, #tpu.memory_space<vmem>>, vector<32x32xbf16>
    %cst_36 = arith.constant dense<0.000000e+00> : vector<16x32xf32>
    %113 = tpu.matmul %111, %112, %cst_36 {dimension_numbers = #tpu.dot_dimension_numbers<[1], [0], [0], [1], [0, 0, 1, 1], [], []>} : vector<16x32xbf16>, vector<32x32xbf16>, vector<16x32xf32> -> vector<16x32xf32>
    %c0_37 = arith.constant 0 : index
    %c0_38 = arith.constant 0 : index
    %114 = vector.load %arg10[%c0_37, %c0_38] : memref<1x32xf32, #tpu.memory_space<vmem>>, vector<1x32xf32>
    %115 = vector.broadcast %114 : vector<1x32xf32> to vector<16x32xf32>
    %116 = arith.addf %113, %115 : vector<16x32xf32>
    %117 = arith.addf %1, %116 : vector<16x32xf32>
    %c0_39 = arith.constant 0 : index
    %c0_40 = arith.constant 0 : index
    %118 = vector.load %arg13[%c0_39, %c0_40] : memref<1x32xf32, #tpu.memory_space<vmem>>, vector<1x32xf32>
    %c0_41 = arith.constant 0 : index
    %c0_42 = arith.constant 0 : index
    %119 = vector.load %arg14[%c0_41, %c0_42] : memref<1x32xf32, #tpu.memory_space<vmem>>, vector<1x32xf32>
    %cst_43 = arith.constant dense<0.000000e+00> : vector<16xf32>
    %120 = vector.multi_reduction <add>, %117, %cst_43 [1] : vector<16x32xf32> to vector<16xf32>
    %121 = vector.shape_cast %120 : vector<16xf32> to vector<16x1xf32>
    %cst_44 = arith.constant 3.200000e+01 : f32
    %122 = vector.broadcast %cst_44 : f32 to vector<16x1xf32>
    %123 = arith.divf %121, %122 : vector<16x1xf32>
    %124 = vector.broadcast %123 : vector<16x1xf32> to vector<16x32xf32>
    %125 = arith.subf %117, %124 : vector<16x32xf32>
    %126 = arith.mulf %125, %125 : vector<16x32xf32>
    %cst_45 = arith.constant dense<0.000000e+00> : vector<16xf32>
    %127 = vector.multi_reduction <add>, %126, %cst_45 [1] : vector<16x32xf32> to vector<16xf32>
    %128 = vector.shape_cast %127 : vector<16xf32> to vector<16x1xf32>
    %cst_46 = arith.constant 0.0322580636 : f32
    %129 = vector.broadcast %cst_46 : f32 to vector<16x1xf32>
    %130 = arith.mulf %128, %129 : vector<16x1xf32>
    %131 = math.sqrt %130 : vector<16x1xf32>
    %cst_47 = arith.constant 9.99999997E-7 : f32
    %132 = vector.broadcast %cst_47 : f32 to vector<16x1xf32>
    %133 = arith.addf %131, %132 : vector<16x1xf32>
    %134 = tpu.reciprocal %133 {approx = true} : vector<16x1xf32> -> vector<16x1xf32>
    %135 = vector.broadcast %134 : vector<16x1xf32> to vector<16x32xf32>
    %136 = vector.broadcast %118 : vector<1x32xf32> to vector<16x32xf32>
    %137 = arith.mulf %135, %136 : vector<16x32xf32>
    %138 = arith.mulf %125, %137 : vector<16x32xf32>
    %139 = vector.broadcast %119 : vector<1x32xf32> to vector<16x32xf32>
    %140 = arith.addf %138, %139 : vector<16x32xf32>
    %141 = arith.truncf %140 : vector<16x32xf32> to vector<16x32xbf16>
    %c0_48 = arith.constant 0 : index
    %c0_49 = arith.constant 0 : index
    %142 = vector.load %arg15[%c0_48, %c0_49] : memref<32x128xbf16, #tpu.memory_space<vmem>>, vector<32x128xbf16>
    %cst_50 = arith.constant dense<0.000000e+00> : vector<16x128xf32>
    %143 = tpu.matmul %141, %142, %cst_50 {dimension_numbers = #tpu.dot_dimension_numbers<[1], [0], [0], [1], [0, 0, 1, 1], [], []>} : vector<16x32xbf16>, vector<32x128xbf16>, vector<16x128xf32> -> vector<16x128xf32>
    %c0_51 = arith.constant 0 : index
    %c0_52 = arith.constant 0 : index
    %144 = vector.load %arg16[%c0_51, %c0_52] : memref<1x128xf32, #tpu.memory_space<vmem>>, vector<1x128xf32>
    %145 = vector.broadcast %144 : vector<1x128xf32> to vector<16x128xf32>
    %146 = arith.addf %143, %145 : vector<16x128xf32>
    %cst_53 = arith.constant 5.000000e-01 : f32
    %147 = vector.broadcast %cst_53 : f32 to vector<16x128xf32>
    %148 = arith.mulf %147, %146 : vector<16x128xf32>
    %149 = arith.mulf %146, %146 : vector<16x128xf32>
    %150 = arith.mulf %149, %146 : vector<16x128xf32>
    %cst_54 = arith.constant 4.471500e-02 : f32
    %151 = vector.broadcast %cst_54 : f32 to vector<16x128xf32>
    %152 = arith.mulf %151, %150 : vector<16x128xf32>
    %153 = arith.addf %146, %152 : vector<16x128xf32>
    %cst_55 = arith.constant 0.797884583 : f32
    %154 = vector.broadcast %cst_55 : f32 to vector<16x128xf32>
    %155 = arith.mulf %154, %153 : vector<16x128xf32>
    %156 = math.tanh %155 : vector<16x128xf32>
    %cst_56 = arith.constant 1.000000e+00 : f32
    %157 = vector.broadcast %cst_56 : f32 to vector<16x128xf32>
    %158 = arith.addf %157, %156 : vector<16x128xf32>
    %159 = arith.mulf %148, %158 : vector<16x128xf32>
    %160 = arith.truncf %159 : vector<16x128xf32> to vector<16x128xbf16>
    %c0_57 = arith.constant 0 : index
    %c0_58 = arith.constant 0 : index
    %161 = vector.load %arg17[%c0_57, %c0_58] : memref<128x32xbf16, #tpu.memory_space<vmem>>, vector<128x32xbf16>
    %cst_59 = arith.constant dense<0.000000e+00> : vector<16x32xf32>
    %162 = tpu.matmul %160, %161, %cst_59 {dimension_numbers = #tpu.dot_dimension_numbers<[1], [0], [0], [1], [0, 0, 1, 1], [], []>} : vector<16x128xbf16>, vector<128x32xbf16>, vector<16x32xf32> -> vector<16x32xf32>
    %c0_60 = arith.constant 0 : index
    %c0_61 = arith.constant 0 : index
    %163 = vector.load %arg18[%c0_60, %c0_61] : memref<1x32xf32, #tpu.memory_space<vmem>>, vector<1x32xf32>
    %164 = vector.broadcast %163 : vector<1x32xf32> to vector<16x32xf32>
    %165 = arith.addf %162, %164 : vector<16x32xf32>
    %166 = arith.addf %117, %165 : vector<16x32xf32>
    %167 = vector.shape_cast %166 : vector<16x32xf32> to vector<2x8x32xf32>
    %c0_62 = arith.constant 0 : index
    %c0_63 = arith.constant 0 : index
    %c0_64 = arith.constant 0 : index
    %168 = vector.load %arg19[%c0_62, %c0_63, %c0_64] : memref<2x8x32xf32, #tpu.memory_space<vmem>>, vector<2x8x32xf32>
    tpu.vector_store %arg19[%c0_62, %c0_63, %c0_64], %167 {strides = array<i32>} : memref<2x8x32xf32, #tpu.memory_space<vmem>>, vector<2x8x32xf32>,
    return
  }
  func.func @transform_0(%arg0: i32) -> (i32, i32, i32) {
    %c0_i32 = arith.constant 0 : i32
    %c0_i32_0 = arith.constant 0 : i32
    %c0_i32_1 = arith.constant 0 : i32
    return %arg0, %c0_i32, %c0_i32_0 : i32, i32, i32
  }
  func.func @transform_1(%arg0: i32) -> (i32, i32, i32) {
    %c0_i32 = arith.constant 0 : i32
    %c0_i32_0 = arith.constant 0 : i32
    %c0_i32_1 = arith.constant 0 : i32
    return %arg0, %c0_i32, %c0_i32_0 : i32, i32, i32
  }
  func.func @transform_2(%arg0: i32) -> (i32, i32) {
    %c0_i32 = arith.constant 0 : i32
    %c0_i32_0 = arith.constant 0 : i32
    %c0_i32_1 = arith.constant 0 : i32
    return %c0_i32, %c0_i32_0 : i32, i32
  }
  func.func @transform_3(%arg0: i32) -> (i32, i32) {
    %c0_i32 = arith.constant 0 : i32
    %c0_i32_0 = arith.constant 0 : i32
    %c0_i32_1 = arith.constant 0 : i32
    return %c0_i32, %c0_i32_0 : i32, i32
  }
  func.func @transform_4(%arg0: i32) -> (i32, i32) {
    %c0_i32 = arith.constant 0 : i32
    %c0_i32_0 = arith.constant 0 : i32
    %c0_i32_1 = arith.constant 0 : i32
    return %c0_i32, %c0_i32_0 : i32, i32
  }
  func.func @transform_5(%arg0: i32) -> (i32, i32) {
    %c0_i32 = arith.constant 0 : i32
    %c0_i32_0 = arith.constant 0 : i32
    %c0_i32_1 = arith.constant 0 : i32
    return %c0_i32, %c0_i32_0 : i32, i32
  }
  func.func @transform_6(%arg0: i32) -> (i32, i32) {
    %c0_i32 = arith.constant 0 : i32
    %c0_i32_0 = arith.constant 0 : i32
    %c0_i32_1 = arith.constant 0 : i32
    return %c0_i32, %c0_i32_0 : i32, i32
  }
  func.func @transform_7(%arg0: i32) -> (i32, i32) {
    %c0_i32 = arith.constant 0 : i32
    %c0_i32_0 = arith.constant 0 : i32
    %c0_i32_1 = arith.constant 0 : i32
    return %c0_i32, %c0_i32_0 : i32, i32
  }
  func.func @transform_8(%arg0: i32) -> (i32, i32) {
    %c0_i32 = arith.constant 0 : i32
    %c0_i32_0 = arith.constant 0 : i32
    %c0_i32_1 = arith.constant 0 : i32
    return %c0_i32, %c0_i32_0 : i32, i32
  }
  func.func @transform_9(%arg0: i32) -> (i32, i32) {
    %c0_i32 = arith.constant 0 : i32
    %c0_i32_0 = arith.constant 0 : i32
    %c0_i32_1 = arith.constant 0 : i32
    return %c0_i32, %c0_i32_0 : i32, i32
  }
  func.func @transform_10(%arg0: i32) -> (i32, i32) {
    %c0_i32 = arith.constant 0 : i32
    %c0_i32_0 = arith.constant 0 : i32
    %c0_i32_1 = arith.constant 0 : i32
    return %c0_i32, %c0_i32_0 : i32, i32
  }
  func.func @transform_11(%arg0: i32) -> (i32, i32) {
    %c0_i32 = arith.constant 0 : i32
    %c0_i32_0 = arith.constant 0 : i32
    %c0_i32_1 = arith.constant 0 : i32
    return %c0_i32, %c0_i32_0 : i32, i32
  }
  func.func @transform_12(%arg0: i32) -> (i32, i32) {
    %c0_i32 = arith.constant 0 : i32
    %c0_i32_0 = arith.constant 0 : i32
    %c0_i32_1 = arith.constant 0 : i32
    return %c0_i32, %c0_i32_0 : i32, i32
  }
  func.func @transform_13(%arg0: i32) -> (i32, i32) {
    %c0_i32 = arith.constant 0 : i32
    %c0_i32_0 = arith.constant 0 : i32
    %c0_i32_1 = arith.constant 0 : i32
    return %c0_i32, %c0_i32_0 : i32, i32
  }
  func.func @transform_14(%arg0: i32) -> (i32, i32) {
    %c0_i32 = arith.constant 0 : i32
    %c0_i32_0 = arith.constant 0 : i32
    %c0_i32_1 = arith.constant 0 : i32
    return %c0_i32, %c0_i32_0 : i32, i32
  }
  func.func @transform_15(%arg0: i32) -> (i32, i32) {
    %c0_i32 = arith.constant 0 : i32
    %c0_i32_0 = arith.constant 0 : i32
    %c0_i32_1 = arith.constant 0 : i32
    return %c0_i32, %c0_i32_0 : i32, i32
  }
  func.func @transform_16(%arg0: i32) -> (i32, i32) {
    %c0_i32 = arith.constant 0 : i32
    %c0_i32_0 = arith.constant 0 : i32
    %c0_i32_1 = arith.constant 0 : i32
    return %c0_i32, %c0_i32_0 : i32, i32
  }
  func.func @transform_17(%arg0: i32) -> (i32, i32) {
    %c0_i32 = arith.constant 0 : i32
    %c0_i32_0 = arith.constant 0 : i32
    %c0_i32_1 = arith.constant 0 : i32
    return %c0_i32, %c0_i32_0 : i32, i32
  }
  func.func @transform_18(%arg0: i32) -> (i32, i32, i32) {
    %c0_i32 = arith.constant 0 : i32
    %c0_i32_0 = arith.constant 0 : i32
    %c0_i32_1 = arith.constant 0 : i32
    return %arg0, %c0_i32, %c0_i32_0 : i32, i32, i32
  }
}

</mosaic_0001>

<bundles_post_ra>
// kernel: tpu_custom_call.1
= control target key start
LH: loop header
LB: loop body
LE: loop exit
PB: predicated region body
PF: predicated region fallthrough
CT: control target
= control target key end

     0   :  { %s2670_s0 = inlined_call_operand.vmem [shape: f32[2,8,32], index: 0, kind: input, shape index: {}]   ;;  %s2671_s1 = inlined_call_operand.vmem [shape: f32[2,1,8], index: 1, kind: input, shape index: {}]   ;;  %s2672_s2 = inlined_call_operand.vmem [shape: bf16[32,32], index: 2, kind: input, shape index: {}]   ;;  %s2673_s3 = inlined_call_operand.hbm [shape: f32[1,32], index: 3, kind: input, shape index: {}]   ;;  %s2674_s4 = inlined_call_operand.vmem [shape: bf16[32,32], index: 4, kind: input, shape index: {}]   ;;  %s2675_s5 = inlined_call_operand.hbm [shape: f32[1,32], index: 5, kind: input, shape index: {}]   ;;  %s2676_s6 = inlined_call_operand.vmem [shape: bf16[32,32], index: 6, kind: input, shape index: {}]   ;;  %s2677_s7 = inlined_call_operand.hbm [shape: f32[1,32], index: 7, kind: input, shape index: {}]   ;;  %s2678_s8 = inlined_call_operand.vmem [shape: bf16[32,32], index: 8, kind: input, shape index: {}]   ;;  %s2679_s9 = inlined_call_operand.hbm [shape: f32[1,32], index: 9, kind: input, shape index: {}]   ;;  %s2680_s10 = inlined_call_operand.vmem [shape: f32[1,32], index: 10, kind: input, shape index: {}]   ;;  %s2681_s11 = inlined_call_operand.vmem [shape: f32[1,32], index: 11, kind: input, shape index: {}]   ;;  %s2682_s12 = inlined_call_operand.vmem [shape: f32[1,32], index: 12, kind: input, shape index: {}]   ;;  %s2683_s13 = inlined_call_operand.vmem [shape: f32[1,32], index: 13, kind: input, shape index: {}]   ;;  %s2684_s14 = inlined_call_operand.vmem [shape: bf16[32,128], index: 14, kind: input, shape index: {}]   ;;  %s2685_s15 = inlined_call_operand.vmem [shape: f32[1,128], index: 15, kind: input, shape index: {}]   ;;  %s2686_s16 = inlined_call_operand.vmem [shape: bf16[128,32], index: 16, kind: input, shape index: {}]   ;;  %s2687_s17 = inlined_call_operand.vmem [shape: f32[1,32], index: 17, kind: input, shape index: {}]   ;;  %s2688_s18 = inlined_call_operand.hbm [shape: f32[2,8,32], index: 18, kind: output, shape index: {}]  }
   0x1   :  { %2692 = sst [smem:[#allocation15_spill]] %s2670_s0 }
   0x2   :  { %2693 = sst [smem:[#allocation16_spill]] %s2671_s1 }
   0x3   :  { %2694 = sst [smem:[#allocation17_spill]] %s2672_s2 }
   0x4   :  { %23 = vsyncpa [#allocation3], 0 }
   0x5   :  { %24 = vsyncpa [#allocation6], 0 }
   0x6   :  { %25 = vsyncpa [#allocation9], 0 }
   0x7   :  { %26 = vsyncpa [#allocation4], 0  ;;  %s2171_s27 = smov [#allocation5]   ;;  %s2172_s29 = smov [#allocation2]  }
   0x8   :  { %s51_s28 = sshll.u32 %s2171_s27, 4  ;;  %s39_s30 = sshll.u32 %s2172_s29, 4  ;;  %s52_s28 = int_to_ptr.vmem [resolvable:$true] %s51_s28  ;;  %s40_s30 = int_to_ptr.vmem [resolvable:$true] %s39_s30 }
   0x9   :  { %s2053_s1 = scalar_lea.hbm %s2675_s5, 16 }
   0xa   :  { %p2054_p0 = scmp.ne.s32.totalorder %s2675_s5, %s2053_s1  ;;  %p2057_p1 = scmp.lt.u32.totalorder %s2053_s1, %s2675_s5 }
   0xc   :  { %p2059_p2 = pnand %p2057_p1, %p2054_p0 }
   0xe   :  { %2062 = shalt.err (!%p2059_p2)
}
   0xf   :  { %s2063_s23 = scalar_lea.vmem %s52_s28, 16  ;;  %s2067_s24 = scalar_lea.vmem %s52_s28, 32 }
  0x10   :  { %p2064_p3 = scmp.ne.s32.totalorder %s52_s28, %s2063_s23  ;;  %p2068_p4 = scmp.lt.s32.totalorder %s52_s28, %s52_s28 }
  0x11   :  { %p2069_p5 = scmp.lt.s32.totalorder %s2067_s24, %s2063_s23 }
  0x13   :  { %p2070_p6 = por %p2069_p5, %p2068_p4 }
  0x15   :  { %p2071_p7 = pnand %p2070_p6, %p2064_p3 }
  0x17   :  { %2074 = shalt.err (!%p2071_p7)
}
  0x18   :  { %54 = dma.hbm_to_vmem [thread:$0]  %s2675_s5, 16, %s52_s28, [#allocation6]  }
  0x19   :  { %s2075_s0 = scalar_lea.hbm %s2673_s3, 16 }
  0x1a   :  { %p2076_p8 = scmp.ne.s32.totalorder %s2673_s3, %s2075_s0  ;;  %p2079_p9 = scmp.lt.u32.totalorder %s2075_s0, %s2673_s3 }
  0x1c   :  { %p2081_p10 = pnand %p2079_p9, %p2076_p8 }
  0x1e   :  { %2084 = shalt.err (!%p2081_p10)
}
  0x1f   :  { %s2085_s22 = scalar_lea.vmem %s40_s30, 16  ;;  %s2089_s2 = scalar_lea.vmem %s40_s30, 32 }
  0x20   :  { %p2086_p11 = scmp.ne.s32.totalorder %s40_s30, %s2085_s22  ;;  %p2090_p12 = scmp.lt.s32.totalorder %s40_s30, %s40_s30 }
  0x21   :  { %p2091_p13 = scmp.lt.s32.totalorder %s2089_s2, %s2085_s22 }
  0x23   :  { %p2092_p0 = por %p2091_p13, %p2090_p12 }
  0x25   :  { %p2093_p1 = pnand %p2092_p0, %p2086_p11 }
  0x27   :  { %2096 = shalt.err (!%p2093_p1)
}
  0x28   :  { %42 = dma.hbm_to_vmem [thread:$0]  %s2673_s3, 16, %s40_s30, [#allocation3]  }
  0x29   :  { %s2173_s23 = smov [#allocation7]   ;;  %s2174_s25 = smov [#allocation8]  }
  0x2a   :  { %s63_s24 = sshll.u32 %s2173_s23, 4  ;;  %s75_s26 = sshll.u32 %s2174_s25, 4  ;;  %s64_s24 = int_to_ptr.vmem [resolvable:$true] %s63_s24  ;;  %s76_s26 = int_to_ptr.vmem [resolvable:$true] %s75_s26 }
  0x2b   :  { %s2097_s0 = scalar_lea.hbm %s2677_s7, 16 }
  0x2c   :  { %p2098_p2 = scmp.ne.s32.totalorder %s2677_s7, %s2097_s0  ;;  %p2101_p3 = scmp.lt.u32.totalorder %s2097_s0, %s2677_s7 }
  0x2e   :  { %p2103_p4 = pnand %p2101_p3, %p2098_p2 }
  0x30   :  { %2106 = shalt.err (!%p2103_p4)
}
  0x31   :  { %s2107_s3 = scalar_lea.vmem %s64_s24, 16  ;;  %s2111_s30 = scalar_lea.vmem %s64_s24, 32 }
  0x32   :  { %p2108_p5 = scmp.ne.s32.totalorder %s64_s24, %s2107_s3  ;;  %p2112_p6 = scmp.lt.s32.totalorder %s64_s24, %s64_s24 }
  0x33   :  { %p2113_p7 = scmp.lt.s32.totalorder %s2111_s30, %s2107_s3 }
  0x35   :  { %p2114_p8 = por %p2113_p7, %p2112_p6 }
  0x37   :  { %p2115_p9 = pnand %p2114_p8, %p2108_p5 }
  0x39   :  { %2118 = shalt.err (!%p2115_p9)
}
  0x3a   :  { %66 = dma.hbm_to_vmem [thread:$0]  %s2677_s7, 16, %s64_s24, [#allocation6]  }
  0x3b   :  { %s2119_s23 = scalar_lea.hbm %s2679_s9, 16 }
  0x3c   :  { %p2120_p10 = scmp.ne.s32.totalorder %s2679_s9, %s2119_s23  ;;  %p2123_p11 = scmp.lt.u32.totalorder %s2119_s23, %s2679_s9 }
  0x3e   :  { %p2125_p12 = pnand %p2123_p11, %p2120_p10 }
  0x40   :  { %2128 = shalt.err (!%p2125_p12)
}
  0x41   :  { %s2129_s19 = scalar_lea.vmem %s76_s26, 16  ;;  %s2133_s1 = scalar_lea.vmem %s76_s26, 32 }
  0x42   :  { %p2130_p13 = scmp.ne.s32.totalorder %s76_s26, %s2129_s19  ;;  %p2134_p0 = scmp.lt.s32.totalorder %s76_s26, %s76_s26 }
  0x43   :  { %p2135_p1 = scmp.lt.s32.totalorder %s2133_s1, %s2129_s19 }
  0x45   :  { %p2136_p2 = por %p2135_p1, %p2134_p0 }
  0x47   :  { %p2137_p3 = pnand %p2136_p2, %p2130_p13 }
  0x49   :  { %2140 = shalt.err (!%p2137_p3)
}
  0x4a   :  { %78 = dma.hbm_to_vmem [thread:$0]  %s2679_s9, 16, %s76_s26, [#allocation9]  }
  0x4b   :  { %2163 = dma.done.wait [#allocation3], 16  }
  0x4c   :  { %2164 = vsyncadd [#allocation3], 4294967280 }
  0x4d   :  { %2165 = dma.done.wait [#allocation6], 32  }
  0x4e   :  { %2166 = vsyncadd [#allocation6], 4294967264 }
  0x4f   :  { %2167 = dma.done.wait [#allocation9], 16  }
  0x50   :  { %2168 = vsyncadd [#allocation9], 4294967280  ;;  %vm116_vm0 = vcmask 261120   ;;  %s2695_s3 = sld [smem:[#allocation15_spill]]  ;;  %s2696_s2 = sld [smem:[#allocation17_spill]]  ;;  %v2175_v15 = vmov 0.0  }
  0x51   :  { %1795 = vmatprep.subr.bf16.mxu0 %v2175_v15  ;;  %vm2176_vm1 = vmmov 0   ;;  %1819 = vmatprep.subr.bf16.mxu1 %v2175_v15  ;;  %v1690_v33 = vld [vmem:[%s2680_s10] ss:$0 sm:$0xff]  ;;  %v1984_v45 = vld [vmem:[%s2674_s4 + $0x8] sm:$0xff]   ;;  %v1696_v54 = vld [vmem:[#allocation5] ss:$0 sm:$0xff] }
  0x52   :  { %1799 = vmatprep.mubr.msk.bf16.mxu0 %vm2176_vm1, %v2175_v15  ;;  %1821 = vmatprep.mubr.msk.bf16.mxu1 %vm2176_vm1, %v2175_v15  ;;  %v1691_v39 = vld [vmem:[%s2681_s11] ss:$0 sm:$0xff]  ;;  %v1986_v47 = vld [vmem:[%s2676_s6 + $0x8] sm:$0xff]   ;;  %vm454_vm6 = vcmask 64512   ;;  %s2179_s21 = smov 104   ;;  %vm942_vm7 = vcmask 1043456  }
  0x53   :  { %v1983_v43 = vld [vmem:[%s2674_s4] sm:$0xff]   ;;  %s2177_s4 = smov 120   ;;  %s2697_s9 = sld [smem:[#allocation16_spill]]  ;;  %vm1334_vm12 = vcmask 130048   ;;  %vm1337_vm13 = vcmask 195584  }
  0x54   :  { %v1985_v46 = vld [vmem:[%s2676_s6] sm:$0xff]   ;;  %s2178_s6 = smov 112   ;;  %s2181_s27 = smov 16  }
  0x55   :  { %v1692_v48 = vld [vmem:[#allocation2] ss:$0 sm:$0xff]  ;;  %s2182_s29 = smov 8  }
  0x56   :  { %v108_v0 = vld [vmem:[%s2695_s3] sm:$0xff]  ;;  %v109_v1 = vld [vmem:[%s2695_s3 + $0x8] sm:$0xff] }
  0x57   :  { %v117_v2 = vsel %vm116_vm0, %v108_v0, 0.0  ;;  %v120_v3 = vsel %vm116_vm0, %v109_v1, 0.0  ;;  %v1981_v14 = vld [vmem:[%s2696_s2] sm:$0xff]   ;;  %v1982_v16 = vld [vmem:[%s2696_s2 + $0x8] sm:$0xff]  }
  0x58   :  { %118 = vadd.xlane.f32.xlu0 %v117_v2  ;;  %1796 = vmatpush3.bf16.msra.mxu0 %v1981_v14 }
  0x59   :  { %1797 = vmatprep.subr.bf16.mxu0 %v2175_v15 }
  0x5c   :  { %121 = vadd.xlane.f32.xlu0 %v120_v3  ;;  %1798 = vmatpush3.bf16.msra.mxu0 %v1982_v16 }
  0x5d   :  { %1803 = vmatprep.subr.bf16.mxu0 %v2175_v15 }
  0xe5   :  { %v119_v4 = vpop.xlane.xlu0 %118 }
  0xe6   :  { %v124_v5 = vmul.f32 0.03125, %v119_v4 }
  0xe8   :  { %v126_v6 = vsub.f32 %v108_v0, %v124_v5 }
  0xe9   :  { %v122_v7 = vpop.xlane.xlu0 %121 }
  0xea   :  { %v125_v8 = vmul.f32 0.03125, %v122_v7  ;;  %v128_v9 = vmul.f32 %v126_v6, %v126_v6 }
  0xec   :  { %v127_v10 = vsub.f32 %v109_v1, %v125_v8  ;;  %v130_v11 = vsel %vm116_vm0, %v128_v9, 0.0  ;;  %v1700_v1 = vld [vmem:[#allocation7] ss:$0 sm:$0xff] }
  0xed   :  { %131 = vadd.xlane.f32.xlu1 %v130_v11 }
  0xee   :  { %v129_v12 = vmul.f32 %v127_v10, %v127_v10 }
  0xf0   :  { %v133_v13 = vsel %vm116_vm0, %v129_v12, 0.0 }
  0xf1   :  { %134 = vadd.xlane.f32.xlu1 %v133_v13 }
 0x17a   :  { %v132_v17 = vpop.xlane.xlu1 %131 }
 0x17b   :  { %v136_v18 = vmul.f32 0.032258064, %v132_v17 }
 0x17d   :  { %1999 = vrsqrt.f32 %v136_v18  ;;  %vm140_vm2 = vcmp.eq.f32.partialorder %v136_v18, inf  ;;  %v143_v23 = vand.u32 2147483648, %v136_v18  ;;  %vm142_vm3 = vcmp.eq.f32.partialorder %v136_v18, 0.0 }
 0x17e   :  { %v135_v19 = vpop.xlane.xlu1 %134 }
 0x17f   :  { %v137_v20 = vmul.f32 0.032258064, %v135_v19 }
 0x181   :  { %2001 = vrsqrt.f32 %v137_v20  ;;  %vm147_vm4 = vcmp.eq.f32.partialorder %v137_v20, inf  ;;  %v150_v29 = vand.u32 2147483648, %v137_v20  ;;  %vm149_vm5 = vcmp.eq.f32.partialorder %v137_v20, 0.0 }
 0x187   :  { %v2000_v21 = vpop.eup %1999 }
 0x188   :  { %v139_v22 = vmul.f32 %v2000_v21, %v136_v18 }
 0x18a   :  { %v141_v24 = vsel %vm140_vm2, %v136_v18, %v139_v22 }
 0x18b   :  { %v2002_v25 = vpop.eup %2001  ;;  %v144_v26 = vsel %vm142_vm3, %v143_v23, %v141_v24 }
 0x18c   :  { %v152_v27 = vadd.f32 1e-06, %v144_v26  ;;  %v146_v28 = vmul.f32 %v2002_v25, %v137_v20 }
 0x18e   :  { %2003 = vrcp.f32 %v152_v27  ;;  %v148_v30 = vsel %vm147_vm4, %v137_v20, %v146_v28 }
 0x18f   :  { %v151_v31 = vsel %vm149_vm5, %v150_v29, %v148_v30 }
 0x190   :  { %v153_v32 = vadd.f32 1e-06, %v151_v31 }
 0x192   :  { %2005 = vrcp.f32 %v153_v32 }
 0x198   :  { %v2004_v34 = vpop.eup %2003 }
 0x199   :  { %v162_v35 = vmul.f32 %v2004_v34, %v1690_v33 }
 0x19b   :  { %v164_v38 = vmul.f32 %v162_v35, %v126_v6 }
 0x19c   :  { %v2006_v36 = vpop.eup %2005 }
 0x19d   :  { %v163_v37 = vmul.f32 %v2006_v36, %v1690_v33  ;;  %v172_v41 = vadd.f32 %v1691_v39, %v164_v38 }
 0x19f   :  { %v165_v40 = vmul.f32 %v163_v37, %v127_v10 }
 0x1a1   :  { %v173_v42 = vadd.f32 %v1691_v39, %v165_v40 }
 0x1a3   :  { %v174_v44 = vpack.c.bf16 %v173_v42, %v172_v41 }
 0x1a5   :  { %1800 = vmatmul.mubr.msk.bf16.vlgmr.msra.gmra.mrb[0].mxu0 %vm116_vm0, %v174_v44 }
 0x1a6   :  { %1804 = vmatpush3.bf16.msra.mxu0 %v1983_v43  ;;  %1807 = vmatprep.mubr.msk.bf16.mxu0 %vm2176_vm1, %v2175_v15 }
 0x1a7   :  { %1805 = vmatprep.subr.bf16.mxu0 %v2175_v15 }
 0x1aa   :  { %1806 = vmatpush3.bf16.msra.mxu0 %v1984_v45  ;;  %v110_v45 = vld [vmem:[%s2697_s9] sm:$0x1] }
 0x1ab   :  { %1811 = vmatprep.subr.bf16.mxu0 %v2175_v15  ;;  %vm112_vm8 = vcmp.gt.f32.partialorder %v110_v45, 0.0 }
 0x1ad   :  { %1808 = vmatmul.mubr.msk.bf16.vlgmr.msra.gmra.mrb[4].mxu0 %vm116_vm0, %v174_v44 }
 0x1ae   :  { %1812 = vmatpush3.bf16.msra.mxu0 %v1985_v46  ;;  %1815 = vmatprep.mubr.msk.bf16.mxu0 %vm2176_vm1, %v2175_v15 }
 0x1af   :  { %1813 = vmatprep.subr.bf16.mxu0 %v2175_v15 }
 0x1b2   :  { %1814 = vmatpush3.bf16.msra.mxu0 %v1986_v47 }
 0x1b3   :  { %1825 = vmatprep.subr.bf16.mxu0 %v2175_v15 }
 0x1b5   :  { %1816 = vmatmul.mubr.msk.bf16.vlgmr.msra.gmra.mrb[8].mxu0 %vm116_vm0, %v174_v44  ;;  %v825_v44 = vlaneseq }
 0x1b6   :  { %1827 = vmatprep.mubr.msk.bf16.mxu0 %vm2176_vm1, %v2175_v15 }
 0x1b7   :  { %v826_v46 = vshrl.u32 %v825_v44, 7 }
 0x1b9   :  { %v827_v47 = vsub.s32 0, %v826_v46 }
 0x278   :  { %v235_v49 = vpop.f32.mrb[0].mxu0 }
 0x279   :  { %v236_v50 = vadd.f32 %v1692_v48, %v235_v49  ;;  %v1801_v51 = vpop.f32.mrb[1].mxu0 }
 0x27a   :  { %v238_v52 = vpop.f32.mrb[2].mxu0 }
 0x27b   :  { %372 = vrot.lane.b32.xlu1 %v236_v50, %s2177_s4  ;;  %v1802_v53 = vpop.f32.mrb[3].mxu0  ;;  %v390_v5 = vpack.c.bf16 %v236_v50, %v236_v50  ;;  %v239_v6 = vadd.f32 %v1692_v48, %v238_v52  ;;  %v2180_v48 = vmov 0  }
 0x27c   :  { %v823_v49 = vsel %vm112_vm8, 1, %v2180_v48 }
 0x27d   :  { %v394_v29 = vpack.c.bf16 %v239_v6, %v239_v6 }
 0x280   :  { %v299_v55 = vpop.f32.mrb[4].mxu0 }
 0x281   :  { %v300_v56 = vadd.f32 %v1696_v54, %v299_v55  ;;  %v1809_v57 = vpop.f32.mrb[5].mxu0 }
 0x282   :  { %v302_v58 = vpop.f32.mrb[6].mxu0  ;;  %v111_v57 = vld [vmem:[%s2697_s9 + $0x1] sm:$0x1] }
 0x283   :  { %406 = vrot.lane.b32.xlu1 %v300_v56, %s2178_s6  ;;  %400 = vrot.lane.b32.xlu0 %v300_v56, %s2177_s4  ;;  %v1810_v59 = vpop.f32.mrb[7].mxu0  ;;  %v418_v60 = vpack.c.bf16 %v300_v56, %v300_v56  ;;  %v303_v63 = vadd.f32 %v1696_v54, %v302_v58  ;;  %vm113_vm10 = vcmp.gt.f32.partialorder %v111_v57, 0.0 }
 0x285   :  { %v459_v61 = vsel %vm454_vm6, %v418_v60, 0  ;;  %v422_v18 = vpack.c.bf16 %v303_v63, %v303_v63  ;;  %v824_v60 = vsel %vm113_vm10, 1, %v2180_v48 }
 0x286   :  { %1820 = vmatpush3.bf16.xpose.msra.mxu1 %v459_v61 }
 0x287   :  { %412 = vrot.lane.b32.xlu1 %v300_v56, %s2179_s21  ;;  %378 = vrot.lane.b32.xlu0 %v236_v50, %s2178_s6  ;;  %v643_v24 = vsel %vm454_vm6, %v422_v18, 0 }
 0x288   :  { %v363_v62 = vpop.f32.mrb[8].mxu0  ;;  %1831 = vmatprep.subr.bf16.mxu1 %v2175_v15 }
 0x289   :  { %v1817_v0 = vpop.f32.mrb[9].mxu0  ;;  %v2417_v31 = vadd.f32 %v1700_v1, %v363_v62 }
 0x28a   :  { %v366_v2 = vpop.f32.mrb[10].mxu0 }
 0x28b   :  { %v2391_v3 = vadd.f32 %v1700_v1, %v366_v2  ;;  %384 = vrot.lane.b32.xlu1 %v236_v50, %s2179_s21  ;;  %402 = vrot.lane.b32.xlu0 %v303_v63, %s2177_s4  ;;  %v1818_v4 = vpop.f32.mrb[11].mxu0  ;;  %v446_v37 = vpack.c.bf16 %v2417_v31, %v2417_v31  ;;  %v828_v50 = vrot.slane %v823_v49, %v827_v47 }
 0x28d   :  { %1822 = vmatmul.mubr.msk.bf16.vlgmr.msra.gmra.mrb[0].mxu1 %vm454_vm6, %v390_v5  ;;  %v944_v41 = vsel %vm942_vm7, %v446_v37, 0  ;;  %vm833_vm9 = vcmp.eq.s32.totalorder %v828_v50, 1 }
 0x28e   :  { %1833 = vmatprep.mubr.msk.bf16.mxu1 %vm2176_vm1, %v2175_v15 }
 0x28f   :  { %408 = vrot.lane.b32.xlu1 %v303_v63, %s2178_s6  ;;  %374 = vrot.lane.b32.xlu0 %v239_v6, %s2177_s4 }
 0x293   :  { %414 = vrot.lane.b32.xlu1 %v303_v63, %s2179_s21  ;;  %380 = vrot.lane.b32.xlu0 %v239_v6, %s2178_s6 }
 0x297   :  { %386 = vrot.lane.b32.xlu1 %v239_v6, %s2179_s21 }
 0x2ed   :  { %v373_v7 = vpop.permute.xlu1 %372 }
 0x2ee   :  { %v391_v20 = vpack.c.bf16 %v373_v7, %v373_v7 }
 0x2f5   :  { %v407_v8 = vpop.permute.xlu1 %406  ;;  %v401_v9 = vpop.permute.xlu0 %400 }
 0x2f6   :  { %v420_v10 = vpack.c.bf16 %v407_v8, %v407_v8  ;;  %v419_v11 = vpack.c.bf16 %v401_v9, %v401_v9  ;;  %v832_v8 = vrot.slane %v824_v60, %v827_v47 }
 0x2f8   :  { %v551_v12 = vsel %vm454_vm6, %v420_v10, 0  ;;  %v505_v13 = vsel %vm454_vm6, %v419_v11, 0  ;;  %vm834_vm11 = vcmp.eq.s32.totalorder %v832_v8, 1 }
 0x2f9   :  { %v413_v14 = vpop.permute.xlu1 %412  ;;  %1826 = vmatpush3.bf16.xpose.msra.mxu0 %v505_v13  ;;  %v379_v16 = vpop.permute.xlu0 %378  ;;  %1832 = vmatpush3.bf16.xpose.msra.mxu1 %v551_v12 }
 0x2fa   :  { %1837 = vmatprep.subr.bf16.mxu0 %v2175_v15  ;;  %1843 = vmatprep.subr.bf16.mxu1 %v2175_v15  ;;  %v421_v17 = vpack.c.bf16 %v413_v14, %v413_v14  ;;  %v392_v21 = vpack.c.bf16 %v379_v16, %v379_v16 }
 0x2fc   :  { %v597_v23 = vsel %vm454_vm6, %v421_v17, 0 }
 0x2fd   :  { %v385_v19 = vpop.permute.xlu1 %384  ;;  %v403_v22 = vpop.permute.xlu0 %402 }
 0x2fe   :  { %v423_v26 = vpack.c.bf16 %v403_v22, %v403_v22  ;;  %v393_v30 = vpack.c.bf16 %v385_v19, %v385_v19 }
 0x300   :  { %1828 = vmatmul.mubr.msk.bf16.vlgmr.msra.gmra.mrb[12].mxu0 %vm454_vm6, %v391_v20  ;;  %1834 = vmatmul.mubr.msk.bf16.vlgmr.msra.gmra.mrb[4].mxu1 %vm454_vm6, %v392_v21  ;;  %v689_v32 = vsel %vm454_vm6, %v423_v26, 0 }
 0x301   :  { %1838 = vmatpush3.bf16.xpose.msra.mxu0 %v597_v23  ;;  %v409_v25 = vpop.permute.xlu1 %408  ;;  %1844 = vmatpush3.bf16.xpose.msra.mxu1 %v643_v24  ;;  %v375_v28 = vpop.permute.xlu0 %374 }
 0x302   :  { %1839 = vmatprep.mubr.msk.bf16.mxu0 %vm2176_vm1, %v2175_v15  ;;  %1845 = vmatprep.mubr.msk.bf16.mxu1 %vm2176_vm1, %v2175_v15  ;;  %v424_v27 = vpack.c.bf16 %v409_v25, %v409_v25  ;;  %v395_v38 = vpack.c.bf16 %v375_v28, %v375_v28 }
 0x303   :  { %1849 = vmatprep.subr.bf16.mxu0 %v2175_v15  ;;  %1855 = vmatprep.subr.bf16.mxu1 %v2175_v15 }
 0x304   :  { %v735_v33 = vsel %vm454_vm6, %v424_v27, 0 }
 0x305   :  { %v415_v34 = vpop.permute.xlu1 %414  ;;  %v381_v35 = vpop.permute.xlu0 %380 }
 0x306   :  { %v425_v36 = vpack.c.bf16 %v415_v34, %v415_v34  ;;  %v396_v39 = vpack.c.bf16 %v381_v35, %v381_v35 }
 0x308   :  { %1840 = vmatmul.mubr.msk.bf16.vlgmr.msra.gmra.mrb[16].mxu0 %vm454_vm6, %v393_v30  ;;  %1846 = vmatmul.mubr.msk.bf16.vlgmr.msra.gmra.mrb[8].mxu1 %vm454_vm6, %v394_v29  ;;  %v781_v40 = vsel %vm454_vm6, %v425_v36, 0 }
 0x309   :  { %1850 = vmatpush3.bf16.xpose.msra.mxu0 %v689_v32  ;;  %1856 = vmatpush3.bf16.xpose.msra.mxu1 %v735_v33  ;;  %v387_v42 = vpop.permute.xlu1 %386 }
 0x30a   :  { %1851 = vmatprep.mubr.msk.bf16.mxu0 %vm2176_vm1, %v2175_v15  ;;  %1857 = vmatprep.mubr.msk.bf16.mxu1 %vm2176_vm1, %v2175_v15  ;;  %v397_v43 = vpack.c.bf16 %v387_v42, %v387_v42 }
 0x30b   :  { %1861 = vmatprep.subr.bf16.mxu0 %v2175_v15  ;;  %1867 = vmatprep.subr.bf16.mxu1 %v2175_v15 }
 0x310   :  { %1852 = vmatmul.mubr.msk.bf16.vlgmr.msra.gmra.mrb[20].mxu0 %vm454_vm6, %v395_v38  ;;  %1858 = vmatmul.mubr.msk.bf16.vlgmr.msra.gmra.mrb[12].mxu1 %vm454_vm6, %v396_v39 }
 0x311   :  { %1862 = vmatpush3.bf16.xpose.msra.mxu0 %v781_v40  ;;  %1868 = vmatpush3.bf16.msra.mxu1 %v944_v41 }
 0x312   :  { %1863 = vmatprep.mubr.msk.bf16.mxu0 %vm2176_vm1, %v2175_v15  ;;  %1873 = vmatprep.subr.bf16.mxu0 %v2175_v15 }
 0x313   :  { %1869 = vmatprep.mubr.msk.bf16.mxu1 %vm2176_vm1, %v2175_v15  ;;  %1879 = vmatprep.subr.bf16.mxu1 %v2175_v15 }
 0x318   :  { %1864 = vmatmul.mubr.msk.bf16.vlgmr.msra.gmra.mrb[24].mxu0 %vm454_vm6, %v397_v43 }
 0x319   :  { %1875 = vmatprep.mubr.msk.bf16.mxu0 %vm2176_vm1, %v2175_v15 }
 0x360   :  { %v495_v51 = vpop.f32.mrb[0].mxu1 }
 0x361   :  { %v2448_v52 = vsel %vm833_vm9, %v495_v51, -1e+09  ;;  %v1823_v53 = vpop.f32.mrb[1].mxu1 }
 0x362   :  { %v498_v54 = vpop.f32.mrb[2].mxu1  ;;  %v843_v55 = vsel %vm454_vm6, %v2448_v52, -inf }
 0x363   :  { %v1824_v56 = vpop.f32.mrb[3].mxu1  ;;  %844 = vmax.xlane.f32.xlu0 %v843_v55 }
 0x3d3   :  { %v541_v58 = vpop.f32.mrb[12].mxu0  ;;  %v587_v59 = vpop.f32.mrb[4].mxu1 }
 0x3d4   :  { %v2456_v61 = vsel %vm833_vm9, %v541_v58, -1e+09  ;;  %v837_v62 = vsel %vm833_vm9, %v587_v59, -1e+09  ;;  %v1829_v63 = vpop.f32.mrb[13].mxu0  ;;  %v1835_v0 = vpop.f32.mrb[5].mxu1 }
 0x3d5   :  { %v544_v1 = vpop.f32.mrb[14].mxu0  ;;  %v590_v2 = vpop.f32.mrb[6].mxu1  ;;  %v849_v4 = vsel %vm454_vm6, %v837_v62, -inf  ;;  %v846_v5 = vsel %vm454_vm6, %v2456_v61, -inf }
 0x3d6   :  { %v1836_v6 = vpop.f32.mrb[7].mxu1  ;;  %850 = vmax.xlane.f32.xlu0 %v849_v4  ;;  %847 = vmax.xlane.f32.xlu1 %v846_v5  ;;  %v1830_v7 = vpop.f32.mrb[15].mxu0 }
 0x3db   :  { %v633_v9 = vpop.f32.mrb[16].mxu0  ;;  %v679_v10 = vpop.f32.mrb[8].mxu1 }
 0x3dc   :  { %v2463_v11 = vsel %vm833_vm9, %v633_v9, -1e+09  ;;  %v1841_v12 = vpop.f32.mrb[17].mxu0  ;;  %v1847_v13 = vpop.f32.mrb[9].mxu1  ;;  %v2468_v18 = vsel %vm834_vm11, %v679_v10, -1e+09 }
 0x3dd   :  { %v636_v14 = vpop.f32.mrb[18].mxu0  ;;  %v682_v16 = vpop.f32.mrb[10].mxu1  ;;  %v852_v17 = vsel %vm454_vm6, %v2463_v11, -inf  ;;  %v855_v21 = vsel %vm454_vm6, %v2468_v18, -inf }
 0x3de   :  { %v1848_v19 = vpop.f32.mrb[11].mxu1  ;;  %853 = vmax.xlane.f32.xlu0 %v852_v17  ;;  %v1842_v20 = vpop.f32.mrb[19].mxu0 }
 0x3e2   :  { %856 = vmax.xlane.f32.xlu0 %v855_v21 }
 0x3e3   :  { %v725_v22 = vpop.f32.mrb[20].mxu0  ;;  %v771_v23 = vpop.f32.mrb[12].mxu1 }
 0x3e4   :  { %v840_v24 = vsel %vm834_vm11, %v725_v22, -1e+09  ;;  %v841_v25 = vsel %vm834_vm11, %v771_v23, -1e+09  ;;  %v1853_v26 = vpop.f32.mrb[21].mxu0  ;;  %v1859_v27 = vpop.f32.mrb[13].mxu1 }
 0x3e5   :  { %v728_v28 = vpop.f32.mrb[22].mxu0  ;;  %v774_v29 = vpop.f32.mrb[14].mxu1  ;;  %v861_v30 = vsel %vm454_vm6, %v841_v25, -inf  ;;  %v858_v32 = vsel %vm454_vm6, %v840_v24, -inf }
 0x3e6   :  { %v1860_v33 = vpop.f32.mrb[15].mxu1  ;;  %862 = vmax.xlane.f32.xlu0 %v861_v30  ;;  %859 = vmax.xlane.f32.xlu1 %v858_v32  ;;  %v1854_v34 = vpop.f32.mrb[23].mxu0 }
 0x3eb   :  { %v817_v35 = vpop.f32.mrb[24].mxu0 }
 0x3ec   :  { %v842_v36 = vsel %vm834_vm11, %v817_v35, -1e+09  ;;  %v1865_v37 = vpop.f32.mrb[25].mxu0  ;;  %v450_v35 = vpack.c.bf16 %v2391_v3, %v2391_v3 }
 0x3ed   :  { %v820_v38 = vpop.f32.mrb[26].mxu0  ;;  %v864_v39 = vsel %vm454_vm6, %v842_v36, -inf }
 0x3ee   :  { %865 = vmax.xlane.f32.xlu1 %v864_v39  ;;  %v1866_v40 = vpop.f32.mrb[27].mxu0 }
 0x3ef   :  { %v1128_v40 = vsel %vm942_vm7, %v450_v35, 0 }
 0x3f0   :  { %v845_v41 = vpop.xlane.xlu0 %844 }
 0x3f1   :  { %v867_v42 = vsub.f32 %v2448_v52, %v845_v41 }
 0x3f3   :  { %v875_v43 = vmul.f32 1.442695, %v867_v42 }
 0x3f5   :  { %2007 = vpow2.f32 %v875_v43 }
 0x3fc   :  { %428 = vrot.lane.b32.xlu0 %v2417_v31, %s2177_s4 }
 0x3ff   :  { %434 = vrot.lane.b32.xlu1 %v2417_v31, %s2178_s6  ;;  %v2008_v44 = vpop.eup %2007 }
 0x400   :  { %v891_v45 = vsel %vm454_vm6, %v2008_v44, 0.0 }
 0x41b   :  { %892 = vadd.xlane.f32.xlu0 %v891_v45 }
 0x463   :  { %v851_v46 = vpop.xlane.xlu0 %850  ;;  %v848_v47 = vpop.xlane.xlu1 %847 }
 0x464   :  { %v869_v48 = vsub.f32 %v837_v62, %v851_v46  ;;  %v868_v49 = vsub.f32 %v2456_v61, %v848_v47 }
 0x466   :  { %v879_v50 = vmul.f32 1.442695, %v869_v48  ;;  %v877_v51 = vmul.f32 1.442695, %v868_v49 }
 0x468   :  { %2009 = vpow2.f32 %v879_v50 }
 0x469   :  { %2011 = vpow2.f32 %v877_v51 }
 0x46b   :  { %v854_v53 = vpop.xlane.xlu0 %853 }
 0x46c   :  { %v870_v63 = vsub.f32 %v2463_v11, %v854_v53 }
 0x46e   :  { %v881_v2 = vmul.f32 1.442695, %v870_v63 }
 0x46f   :  { %v857_v54 = vpop.xlane.xlu0 %856 }
 0x470   :  { %v871_v62 = vsub.f32 %v2468_v18, %v857_v54 }
 0x472   :  { %v2485_v55 = vpop.eup %2009  ;;  %v883_v1 = vmul.f32 1.442695, %v871_v62 }
 0x473   :  { %v2487_v52 = vpop.eup %2011  ;;  %v863_v56 = vpop.xlane.xlu0 %862  ;;  %v897_v57 = vsel %vm454_vm6, %v2485_v55, 0.0 }
 0x474   :  { %898 = vadd.xlane.f32.xlu0 %v897_v57  ;;  %v894_v58 = vsel %vm454_vm6, %v2487_v52, 0.0  ;;  %v860_v0 = vpop.xlane.xlu1 %859  ;;  %2013 = vpow2.f32 %v883_v1  ;;  %v873_v5 = vsub.f32 %v841_v25, %v863_v56 }
 0x475   :  { %895 = vadd.xlane.f32.xlu1 %v894_v58  ;;  %v872_v4 = vsub.f32 %v840_v24, %v860_v0  ;;  %2015 = vpow2.f32 %v881_v2 }
 0x476   :  { %v887_v8 = vmul.f32 1.442695, %v873_v5 }
 0x477   :  { %v429_v59 = vpop.permute.xlu0 %428  ;;  %v885_v6 = vmul.f32 1.442695, %v872_v4 }
 0x478   :  { %v447_v60 = vpack.c.bf16 %v429_v59, %v429_v59 }
 0x479   :  { %2017 = vpow2.f32 %v885_v6 }
 0x47a   :  { %v990_v61 = vsel %vm942_vm7, %v447_v60, 0  ;;  %2019 = vpow2.f32 %v887_v8 }
 0x47b   :  { %1874 = vmatpush3.bf16.msra.mxu0 %v990_v61  ;;  %v866_v7 = vpop.xlane.xlu1 %865 }
 0x47c   :  { %1885 = vmatprep.subr.bf16.mxu0 %v2175_v15  ;;  %v874_v9 = vsub.f32 %v842_v36, %v866_v7 }
 0x47e   :  { %v889_v10 = vmul.f32 1.442695, %v874_v9  ;;  %v2501_v12 = vpop.eup %2013 }
 0x47f   :  { %v903_v13 = vsel %vm454_vm6, %v2501_v12, 0.0  ;;  %v435_v19 = vpop.permute.xlu1 %434 }
 0x480   :  { %2021 = vpow2.f32 %v889_v10  ;;  %v448_v23 = vpack.c.bf16 %v435_v19, %v435_v19 }
 0x482   :  { %v1036_v27 = vsel %vm942_vm7, %v448_v23, 0 }
 0x486   :  { %430 = vrot.lane.b32.xlu1 %v2391_v3, %s2177_s4 }
 0x48a   :  { %440 = vrot.lane.b32.xlu0 %v2417_v31, %s2179_s21  ;;  %v2503_v31 = vpop.eup %2015 }
 0x48b   :  { %v900_v14 = vsel %vm454_vm6, %v2503_v31, 0.0  ;;  %v2509_v16 = vpop.eup %2017 }
 0x48c   :  { %v906_v17 = vsel %vm454_vm6, %v2509_v16, 0.0  ;;  %v2513_v18 = vpop.eup %2019 }
 0x48d   :  { %v909_v20 = vsel %vm454_vm6, %v2513_v18, 0.0  ;;  %v2517_v21 = vpop.eup %2021 }
 0x48e   :  { %v912_v25 = vsel %vm454_vm6, %v2517_v21, 0.0 }
 0x4a8   :  { %v893_v11 = vpop.xlane.xlu0 %892 }
 0x4a9   :  { %2023 = vrcp.f32 %v893_v11  ;;  %904 = vadd.xlane.f32.xlu0 %v903_v13 }
 0x4aa   :  { %901 = vadd.xlane.f32.xlu1 %v900_v14 }
 0x4ae   :  { %907 = vadd.xlane.f32.xlu1 %v906_v17 }
 0x4b2   :  { %910 = vadd.xlane.f32.xlu1 %v909_v20 }
 0x4b3   :  { %v2024_v22 = vpop.eup %2023 }
 0x4b4   :  { %v923_v24 = vmul.f32 %v2024_v22, %v2008_v44  ;;  %v1987_v22 = vld [vmem:[%s2678_s8] sm:$0xff]  }
 0x4b6   :  { %913 = vadd.xlane.f32.xlu1 %v912_v25  ;;  %v931_v26 = vpack.c.bf16 %v923_v24, %v923_v24 }
 0x4b8   :  { %1870 = vmatmul.mubr.msk.bf16.vlgmr.msra.gmra.mrb[16].mxu1 %vm454_vm6, %v931_v26 }
 0x4b9   :  { %1880 = vmatpush3.bf16.msra.mxu1 %v1036_v27  ;;  %1881 = vmatprep.mubr.msk.bf16.mxu1 %vm2176_vm1, %v2175_v15 }
 0x4ba   :  { %1891 = vmatprep.subr.bf16.mxu1 %v2175_v15 }
 0x4bf   :  { %436 = vrot.lane.b32.xlu0 %v2391_v3, %s2178_s6 }
 0x4c7   :  { %442 = vrot.lane.b32.xlu1 %v2391_v3, %s2179_s21 }
 0x501   :  { %v899_v28 = vpop.xlane.xlu0 %898 }
 0x502   :  { %2025 = vrcp.f32 %v899_v28  ;;  %v896_v29 = vpop.xlane.xlu1 %895  ;;  %v1988_v28 = vld [vmem:[%s2678_s8 + $0x8] sm:$0xff]   ;;  %s2183_s8 = smov 24  }
 0x503   :  { %2027 = vrcp.f32 %v896_v29 }
 0x505   :  { %v441_v30 = vpop.permute.xlu0 %440 }
 0x506   :  { %v449_v37 = vpack.c.bf16 %v441_v30, %v441_v30  ;;  %v431_v3 = vpop.permute.xlu1 %430 }
 0x507   :  { %v451_v51 = vpack.c.bf16 %v431_v3, %v431_v3 }
 0x508   :  { %v1082_v41 = vsel %vm942_vm7, %v449_v37, 0 }
 0x509   :  { %v1174_v58 = vsel %vm942_vm7, %v451_v51, 0 }
 0x50c   :  { %v2026_v32 = vpop.eup %2025 }
 0x50d   :  { %v2028_v33 = vpop.eup %2027  ;;  %v925_v34 = vmul.f32 %v2026_v32, %v2485_v55 }
 0x50e   :  { %v924_v36 = vmul.f32 %v2028_v33, %v2487_v52 }
 0x50f   :  { %v933_v38 = vpack.c.bf16 %v925_v34, %v925_v34 }
 0x510   :  { %v932_v39 = vpack.c.bf16 %v924_v36, %v924_v36 }
 0x511   :  { %1882 = vmatmul.mubr.msk.bf16.vlgmr.msra.gmra.mrb[20].mxu1 %vm454_vm6, %v933_v38 }
 0x512   :  { %1876 = vmatmul.mubr.msk.bf16.vlgmr.msra.gmra.mrb[28].mxu0 %vm454_vm6, %v932_v39  ;;  %1892 = vmatpush3.bf16.msra.mxu1 %v1128_v40 }
 0x513   :  { %1886 = vmatpush3.bf16.msra.mxu0 %v1082_v41  ;;  %1887 = vmatprep.mubr.msk.bf16.mxu0 %vm2176_vm1, %v2175_v15 }
 0x514   :  { %1893 = vmatprep.mubr.msk.bf16.mxu1 %vm2176_vm1, %v2175_v15  ;;  %1897 = vmatprep.subr.bf16.mxu0 %v2175_v15 }
 0x515   :  { %1903 = vmatprep.subr.bf16.mxu1 %v2175_v15 }
 0x536   :  { %v905_v42 = vpop.xlane.xlu0 %904 }
 0x537   :  { %2029 = vrcp.f32 %v905_v42  ;;  %v902_v43 = vpop.xlane.xlu1 %901 }
 0x538   :  { %2031 = vrcp.f32 %v902_v43 }
 0x53a   :  { %v437_v45 = vpop.permute.xlu0 %436 }
 0x53b   :  { %v908_v44 = vpop.xlane.xlu1 %907  ;;  %v452_v50 = vpack.c.bf16 %v437_v45, %v437_v45 }
 0x53c   :  { %2033 = vrcp.f32 %v908_v44 }
 0x53d   :  { %v1220_v57 = vsel %vm942_vm7, %v452_v50, 0 }
 0x53f   :  { %v911_v46 = vpop.xlane.xlu1 %910 }
 0x540   :  { %2035 = vrcp.f32 %v911_v46 }
 0x541   :  { %v2030_v47 = vpop.eup %2029 }
 0x542   :  { %v2032_v48 = vpop.eup %2031  ;;  %v927_v49 = vmul.f32 %v2030_v47, %v2501_v12 }
 0x543   :  { %v926_v53 = vmul.f32 %v2032_v48, %v2503_v31  ;;  %v914_v54 = vpop.xlane.xlu1 %913 }
 0x544   :  { %2037 = vrcp.f32 %v914_v54  ;;  %v935_v55 = vpack.c.bf16 %v927_v49, %v927_v49 }
 0x545   :  { %v934_v52 = vpack.c.bf16 %v926_v53, %v926_v53 }
 0x546   :  { %v2034_v56 = vpop.eup %2033  ;;  %1894 = vmatmul.mubr.msk.bf16.vlgmr.msra.gmra.mrb[24].mxu1 %vm454_vm6, %v935_v55 }
 0x547   :  { %1888 = vmatmul.mubr.msk.bf16.vlgmr.msra.gmra.mrb[32].mxu0 %vm454_vm6, %v934_v52  ;;  %1904 = vmatpush3.bf16.msra.mxu1 %v1220_v57  ;;  %v443_v59 = vpop.permute.xlu1 %442  ;;  %v928_v60 = vmul.f32 %v2034_v56, %v2509_v16 }
 0x548   :  { %1898 = vmatpush3.bf16.msra.mxu0 %v1174_v58  ;;  %1899 = vmatprep.mubr.msk.bf16.mxu0 %vm2176_vm1, %v2175_v15  ;;  %v453_v63 = vpack.c.bf16 %v443_v59, %v443_v59 }
 0x549   :  { %1905 = vmatprep.mubr.msk.bf16.mxu1 %vm2176_vm1, %v2175_v15  ;;  %1909 = vmatprep.subr.bf16.mxu0 %v2175_v15  ;;  %v936_v0 = vpack.c.bf16 %v928_v60, %v928_v60  ;;  %v1720_v60 = vld [vmem:[#allocation8] ss:$0 sm:$0xff] }
 0x54a   :  { %v2036_v61 = vpop.eup %2035  ;;  %1915 = vmatprep.subr.bf16.mxu1 %v2175_v15  ;;  %v1266_v4 = vsel %vm942_vm7, %v453_v63, 0 }
 0x54b   :  { %v929_v62 = vmul.f32 %v2036_v61, %v2513_v18 }
 0x54d   :  { %v937_v1 = vpack.c.bf16 %v929_v62, %v929_v62 }
 0x54e   :  { %v2038_v2 = vpop.eup %2037 }
 0x54f   :  { %1900 = vmatmul.mubr.msk.bf16.vlgmr.msra.gmra.mrb[36].mxu0 %vm454_vm6, %v936_v0  ;;  %1906 = vmatmul.mubr.msk.bf16.vlgmr.msra.gmra.mrb[28].mxu1 %vm454_vm6, %v937_v1  ;;  %v930_v5 = vmul.f32 %v2038_v2, %v2517_v21  ;;  %v2051_v1 = vld [vmem:[%s2695_s3] sm:$0xff] }
 0x550   :  { %1910 = vmatpush3.bf16.msra.mxu0 %v1266_v4  ;;  %1911 = vmatprep.mubr.msk.bf16.mxu0 %vm2176_vm1, %v2175_v15 }
 0x551   :  { %1919 = vmatprep.mubr.msk.bf16.mxu1 %vm2176_vm1, %v2175_v15  ;;  %1923 = vmatprep.subr.bf16.mxu0 %v2175_v15  ;;  %v938_v6 = vpack.c.bf16 %v930_v5, %v930_v5 }
 0x552   :  { %1916 = vmatpush3.bf16.msra.mxu1 %v1987_v22 }
 0x553   :  { %1917 = vmatprep.subr.bf16.mxu1 %v2175_v15 }
 0x556   :  { %1918 = vmatpush3.bf16.msra.mxu1 %v1988_v28 }
 0x557   :  { %1912 = vmatmul.mubr.msk.bf16.vlgmr.msra.gmra.mrb[40].mxu0 %vm454_vm6, %v938_v6  ;;  %1931 = vmatprep.subr.bf16.mxu1 %v2175_v15  ;;  %v2052_v6 = vld [vmem:[%s2695_s3 + $0x8] sm:$0xff]  ;;  %s2184_s3 = smov [#allocation10]  }
 0x558   :  { %1927 = vmatprep.mubr.msk.bf16.mxu0 %vm2176_vm1, %v2175_v15  ;;  %s1676_s11 = sshll.u32 %s2184_s3, 4  ;;  %s1677_s11 = int_to_ptr.vmem [resolvable:$true] %s1676_s11 }
 0x559   :  { %s2141_s7 = scalar_lea.vmem %s1677_s11, 256  ;;  %p2146_p5 = scmp.lt.s32.totalorder %s1677_s11, %s1677_s11 }
 0x55a   :  { %p2142_p4 = scmp.ne.s32.totalorder %s1677_s11, %s2141_s7  ;;  %p2147_p6 = scmp.lt.s32.totalorder %s2141_s7, %s2141_s7 }
 0x55c   :  { %p2148_p7 = por %p2147_p6, %p2146_p5 }
 0x55e   :  { %p2149_p8 = pnand %p2148_p7, %p2142_p4 }
 0x58b   :  { %v980_v7 = vpop.f32.mrb[16].mxu1 }
 0x58c   :  { %v1871_v8 = vpop.f32.mrb[17].mxu1 }
 0x58d   :  { %v983_v9 = vpop.f32.mrb[18].mxu1 }
 0x58e   :  { %v1872_v10 = vpop.f32.mrb[19].mxu1 }
 0x5e4   :  { %v1072_v12 = vpop.f32.mrb[20].mxu1 }
 0x5e5   :  { %v1026_v31 = vpop.f32.mrb[28].mxu0  ;;  %v1883_v11 = vpop.f32.mrb[21].mxu1 }
 0x5e6   :  { %v1877_v13 = vpop.f32.mrb[29].mxu0  ;;  %v1075_v14 = vpop.f32.mrb[22].mxu1 }
 0x5e7   :  { %v1029_v16 = vpop.f32.mrb[30].mxu0  ;;  %v1884_v17 = vpop.f32.mrb[23].mxu1 }
 0x5e8   :  { %v1878_v18 = vpop.f32.mrb[31].mxu0 }
 0x619   :  { %v1164_v19 = vpop.f32.mrb[24].mxu1 }
 0x61a   :  { %v1118_v20 = vpop.f32.mrb[32].mxu0  ;;  %v1895_v21 = vpop.f32.mrb[25].mxu1 }
 0x61b   :  { %v1889_v23 = vpop.f32.mrb[33].mxu0  ;;  %v1167_v24 = vpop.f32.mrb[26].mxu1  ;;  %v1990_v21 = vld [vmem:[%s2684_s14 + $0x8] sm:$0xff]  }
 0x61c   :  { %v1121_v25 = vpop.f32.mrb[34].mxu0  ;;  %v1896_v26 = vpop.f32.mrb[27].mxu1 }
 0x61d   :  { %v1890_v27 = vpop.f32.mrb[35].mxu0 }
 0x622   :  { %v1210_v29 = vpop.f32.mrb[36].mxu0  ;;  %v1256_v30 = vpop.f32.mrb[28].mxu1 }
 0x623   :  { %v1966_v32 = vpack.i.bf16 %v1210_v29, %v1026_v31  ;;  %v1971_v33 = vpack.i.bf16 %v1256_v30, %v1072_v12  ;;  %v1901_v34 = vpop.f32.mrb[37].mxu0  ;;  %v1907_v35 = vpop.f32.mrb[29].mxu1 }
 0x624   :  { %v1213_v36 = vpop.f32.mrb[38].mxu0  ;;  %v1259_v37 = vpop.f32.mrb[30].mxu1 }
 0x625   :  { %1972 = vrot.lane.b32.xlu1 %v1971_v33, %s2181_s27  ;;  %v1908_v38 = vpop.f32.mrb[31].mxu1  ;;  %1967 = vrot.lane.b32.xlu0 %v1966_v32, %s2182_s29  ;;  %v1902_v39 = vpop.f32.mrb[39].mxu0 }
 0x626   :  { %v1724_v39 = vld [vmem:[%s2682_s12] ss:$0 sm:$0xff] }
 0x62a   :  { %v1302_v40 = vpop.f32.mrb[40].mxu0 }
 0x62b   :  { %v1976_v41 = vpack.i.bf16 %v1302_v40, %v1118_v20  ;;  %v1913_v3 = vpop.f32.mrb[41].mxu0  ;;  %v1989_v20 = vld [vmem:[%s2684_s14] sm:$0xff]  }
 0x62c   :  { %v1305_v42 = vpop.f32.mrb[42].mxu0  ;;  %1924 = vmatpush3.bf16.msra.mxu0 %v1989_v20 }
 0x62d   :  { %1977 = vrot.lane.b32.xlu0 %v1976_v41, %s2183_s8  ;;  %v1914_v43 = vpop.f32.mrb[43].mxu0  ;;  %1925 = vmatprep.subr.bf16.mxu0 %v2175_v15 }
 0x630   :  { %1926 = vmatpush3.bf16.msra.mxu0 %v1990_v21  ;;  %v1730_v21 = vld [vmem:[%s2687_s17] ss:$0 sm:$0xff] }
 0x697   :  { %v1968_v44 = vpop.permute.xlu0 %1967  ;;  %v1973_v45 = vpop.permute.xlu1 %1972 }
 0x698   :  { %v1970_v46 = vunpack.i.h.bf16 %v1968_v44  ;;  %v1969_v47 = vunpack.i.l.bf16 %v1968_v44  ;;  %v1975_v48 = vunpack.i.h.bf16 %v1973_v45  ;;  %v1974_v49 = vunpack.i.l.bf16 %v1973_v45  ;;  %v1725_v44 = vld [vmem:[%s2683_s13] ss:$0 sm:$0xff] }
 0x69a   :  { %v1333_v50 = vsel %vm454_vm6, %v1164_v19, %v1970_v46  ;;  %v1332_v51 = vsel %vm454_vm6, %v980_v7, %v1969_v47 }
 0x69b   :  { %v1335_v52 = vsel %vm1334_vm12, %v1332_v51, %v1974_v49  ;;  %v1336_v56 = vsel %vm1334_vm12, %v1333_v50, %v1975_v48  ;;  %v1991_v49 = vld [vmem:[%s2686_s16] sm:$0xff]   ;;  %v1992_v50 = vld [vmem:[%s2686_s16 + $0x8] sm:$0xff]   ;;  %v1993_v51 = vld [vmem:[%s2686_s16 + $0x10] sm:$0xff]  }
 0x69f   :  { %v1978_v53 = vpop.permute.xlu0 %1977 }
 0x6a0   :  { %v1980_v54 = vunpack.i.h.bf16 %v1978_v53  ;;  %v1979_v55 = vunpack.i.l.bf16 %v1978_v53  ;;  %v1994_v53 = vld [vmem:[%s2686_s16 + $0x18] sm:$0xff]  }
 0x6a2   :  { %v1339_v57 = vsel %vm1337_vm13, %v1336_v56, %v1980_v54  ;;  %v1338_v58 = vsel %vm1337_vm13, %v1335_v52, %v1979_v55  ;;  %v1995_v54 = vld [vmem:[%s2686_s16 + $0x20] sm:$0xff]   ;;  %v1996_v55 = vld [vmem:[%s2686_s16 + $0x28] sm:$0xff]   ;;  %v1997_v52 = vld [vmem:[%s2686_s16 + $0x30] sm:$0xff]  }
 0x6a3   :  { %v1340_v59 = vpack.c.bf16 %v1339_v57, %v1338_v58  ;;  %v1998_v56 = vld [vmem:[%s2686_s16 + $0x38] sm:$0xff]   ;;  %v1726_v57 = vld [vmem:[%s2685_s15] ss:$0 sm:$0xff] }
 0x6a5   :  { %1920 = vmatmul.mubr.msk.bf16.vlgmr.msra.gmra.mrb[32].mxu1 %vm116_vm0, %v1340_v59 }
 0x6a6   :  { %1947 = vmatprep.mubr.msk.bf16.mxu1 %vm2176_vm1, %v2175_v15  ;;  %1932 = vmatpush3.bf16.msra.mxu1 %v1991_v49 }
 0x6a7   :  { %1933 = vmatprep.subr.bf16.mxu1 %v2175_v15 }
 0x6aa   :  { %1934 = vmatpush3.bf16.msra.mxu1 %v1992_v50 }
 0x6ab   :  { %1935 = vmatprep.subr.bf16.mxu1 %v2175_v15 }
 0x6ae   :  { %1936 = vmatpush3.bf16.msra.mxu1 %v1993_v51 }
 0x6af   :  { %1937 = vmatprep.subr.bf16.mxu1 %v2175_v15 }
 0x6b2   :  { %1938 = vmatpush3.bf16.msra.mxu1 %v1994_v53 }
 0x6b3   :  { %1939 = vmatprep.subr.bf16.mxu1 %v2175_v15 }
 0x6b6   :  { %1940 = vmatpush3.bf16.msra.mxu1 %v1995_v54 }
 0x6b7   :  { %1941 = vmatprep.subr.bf16.mxu1 %v2175_v15 }
 0x6ba   :  { %1942 = vmatpush3.bf16.msra.mxu1 %v1996_v55 }
 0x6bb   :  { %1943 = vmatprep.subr.bf16.mxu1 %v2175_v15 }
 0x6be   :  { %1944 = vmatpush3.bf16.msra.mxu1 %v1997_v52 }
 0x6bf   :  { %1945 = vmatprep.subr.bf16.mxu1 %v2175_v15 }
 0x6c2   :  { %1946 = vmatpush3.bf16.msra.mxu1 %v1998_v56 }
 0x778   :  { %v1401_v61 = vpop.f32.mrb[32].mxu1 }
 0x779   :  { %v1402_v62 = vadd.f32 %v1720_v60, %v1401_v61  ;;  %v1921_v63 = vpop.f32.mrb[33].mxu1 }
 0x77a   :  { %v1404_v0 = vpop.f32.mrb[34].mxu1 }
 0x77b   :  { %v2587_v2 = vadd.f32 %v2051_v1, %v1402_v62  ;;  %v1405_v4 = vadd.f32 %v1720_v60, %v1404_v0  ;;  %v1922_v5 = vpop.f32.mrb[35].mxu1 }
 0x77d   :  { %v2592_v7 = vadd.f32 %v2052_v6, %v1405_v4  ;;  %v1412_v8 = vsel %vm116_vm0, %v2587_v2, 0.0 }
 0x77e   :  { %1413 = vadd.xlane.f32.xlu1 %v1412_v8 }
 0x77f   :  { %v1415_v9 = vsel %vm116_vm0, %v2592_v7, 0.0 }
 0x780   :  { %1416 = vadd.xlane.f32.xlu0 %v1415_v9 }
 0x80b   :  { %v1414_v10 = vpop.xlane.xlu1 %1413 }
 0x80c   :  { %v1418_v12 = vmul.f32 0.03125, %v1414_v10 }
 0x80d   :  { %v1417_v31 = vpop.xlane.xlu0 %1416 }
 0x80e   :  { %v1420_v11 = vsub.f32 %v2587_v2, %v1418_v12  ;;  %v1419_v13 = vmul.f32 0.03125, %v1417_v31 }
 0x810   :  { %v1421_v14 = vsub.f32 %v2592_v7, %v1419_v13  ;;  %v1422_v16 = vmul.f32 %v1420_v11, %v1420_v11 }
 0x812   :  { %v1424_v17 = vsel %vm116_vm0, %v1422_v16, 0.0  ;;  %v1423_v18 = vmul.f32 %v1421_v14, %v1421_v14 }
 0x813   :  { %1425 = vadd.xlane.f32.xlu0 %v1424_v17 }
 0x814   :  { %v1427_v19 = vsel %vm116_vm0, %v1423_v18, 0.0 }
 0x817   :  { %1428 = vadd.xlane.f32.xlu0 %v1427_v19 }
 0x8a0   :  { %v1426_v22 = vpop.xlane.xlu0 %1425 }
 0x8a1   :  { %v1430_v23 = vmul.f32 0.032258064, %v1426_v22 }
 0x8a3   :  { %2039 = vrsqrt.f32 %v1430_v23  ;;  %vm1434_vm14 = vcmp.eq.f32.partialorder %v1430_v23, inf  ;;  %v1437_v28 = vand.u32 2147483648, %v1430_v23  ;;  %vm1436_vm15 = vcmp.eq.f32.partialorder %v1430_v23, 0.0 }
 0x8a4   :  { %v1429_v24 = vpop.xlane.xlu0 %1428 }
 0x8a5   :  { %v1431_v25 = vmul.f32 0.032258064, %v1429_v24 }
 0x8a7   :  { %2041 = vrsqrt.f32 %v1431_v25  ;;  %vm1441_vm1 = vcmp.eq.f32.partialorder %v1431_v25, inf  ;;  %v1444_v35 = vand.u32 2147483648, %v1431_v25  ;;  %vm1443_vm2 = vcmp.eq.f32.partialorder %v1431_v25, 0.0 }
 0x8ad   :  { %v2040_v26 = vpop.eup %2039 }
 0x8ae   :  { %v1433_v27 = vmul.f32 %v2040_v26, %v1430_v23 }
 0x8b0   :  { %v1435_v29 = vsel %vm1434_vm14, %v1430_v23, %v1433_v27 }
 0x8b1   :  { %v2042_v30 = vpop.eup %2041  ;;  %v1438_v32 = vsel %vm1436_vm15, %v1437_v28, %v1435_v29 }
 0x8b2   :  { %v1446_v33 = vadd.f32 1e-06, %v1438_v32  ;;  %v1440_v34 = vmul.f32 %v2042_v30, %v1431_v25 }
 0x8b4   :  { %2043 = vrcp.f32 %v1446_v33  ;;  %v1442_v36 = vsel %vm1441_vm1, %v1431_v25, %v1440_v34 }
 0x8b5   :  { %v1445_v37 = vsel %vm1443_vm2, %v1444_v35, %v1442_v36 }
 0x8b6   :  { %v1447_v38 = vadd.f32 1e-06, %v1445_v37 }
 0x8b8   :  { %2045 = vrcp.f32 %v1447_v38 }
 0x8be   :  { %v2044_v40 = vpop.eup %2043 }
 0x8bf   :  { %v1456_v41 = vmul.f32 %v2044_v40, %v1724_v39 }
 0x8c1   :  { %v1458_v43 = vmul.f32 %v1456_v41, %v1420_v11 }
 0x8c2   :  { %v2046_v3 = vpop.eup %2045 }
 0x8c3   :  { %v1457_v42 = vmul.f32 %v2046_v3, %v1724_v39  ;;  %v1466_v46 = vadd.f32 %v1725_v44, %v1458_v43 }
 0x8c5   :  { %v1459_v45 = vmul.f32 %v1457_v42, %v1421_v14 }
 0x8c7   :  { %v1467_v47 = vadd.f32 %v1725_v44, %v1459_v45 }
 0x8c9   :  { %v1468_v48 = vpack.c.bf16 %v1467_v47, %v1466_v46 }
 0x8cb   :  { %1928 = vmatmul.mubr.msk.bf16.vlgmr.msra.gmra.mrb[44].mxu0 %vm116_vm0, %v1468_v48 }
 0x99e   :  { %v1529_v58 = vpop.f32.mrb[44].mxu0 }
 0x99f   :  { %v1530_v59 = vadd.f32 %v1726_v57, %v1529_v58  ;;  %v1929_v60 = vpop.f32.mrb[45].mxu0 }
 0x9a0   :  { %v1532_v61 = vpop.f32.mrb[46].mxu0 }
 0x9a1   :  { %v1538_v62 = vmul.f32 %v1530_v59, %v1530_v59  ;;  %v1533_v63 = vadd.f32 %v1726_v57, %v1532_v61  ;;  %v1930_v0 = vpop.f32.mrb[47].mxu0  ;;  %v1536_v14 = vmul.f32 0.5, %v1530_v59 }
 0x9a3   :  { %v1540_v1 = vmul.f32 %v1538_v62, %v1530_v59  ;;  %v1539_v4 = vmul.f32 %v1533_v63, %v1533_v63  ;;  %v1537_v16 = vmul.f32 0.5, %v1533_v63 }
 0x9a5   :  { %v1542_v5 = vmul.f32 0.044715, %v1540_v1  ;;  %v1541_v6 = vmul.f32 %v1539_v4, %v1533_v63 }
 0x9a7   :  { %v1544_v8 = vadd.f32 %v1542_v5, %v1530_v59  ;;  %v1543_v9 = vmul.f32 0.044715, %v1541_v6 }
 0x9a9   :  { %v1546_v10 = vmul.f32 0.7978846, %v1544_v8  ;;  %v1545_v15 = vadd.f32 %v1543_v9, %v1533_v63 }
 0x9ab   :  { %2047 = vtanh.f32 %v1546_v10  ;;  %v1547_v12 = vmul.f32 0.7978846, %v1545_v15 }
 0x9ad   :  { %2049 = vtanh.f32 %v1547_v12 }
 0x9b5   :  { %v2048_v31 = vpop.eup %2047 }
 0x9b6   :  { %v1550_v11 = vadd.f32 1.0, %v2048_v31 }
 0x9b7   :  { %v2050_v13 = vpop.eup %2049 }
 0x9b8   :  { %v1551_v17 = vadd.f32 1.0, %v2050_v13  ;;  %v1552_v18 = vmul.f32 %v1550_v11, %v1536_v14 }
 0x9ba   :  { %v1553_v19 = vmul.f32 %v1551_v17, %v1537_v16 }
 0x9bc   :  { %v1554_v20 = vpack.c.bf16 %v1553_v19, %v1552_v18 }
 0x9be   :  { %1948 = vmatmul.mubr.bf16.vlgmr.msra.gmra.mrb[36].mxu1 %v1554_v20 }
 0xa91   :  { %v1660_v22 = vpop.f32.mrb[36].mxu1 }
 0xa92   :  { %v1661_v23 = vadd.f32 %v1730_v21, %v1660_v22  ;;  %v1949_v24 = vpop.f32.mrb[37].mxu1 }
 0xa93   :  { %v1663_v25 = vpop.f32.mrb[38].mxu1 }
 0xa94   :  { %v1667_v26 = vadd.f32 %v1661_v23, %v2587_v2  ;;  %v1664_v27 = vadd.f32 %v1730_v21, %v1663_v25  ;;  %v1950_v28 = vpop.f32.mrb[39].mxu1 }
 0xa96   :  { %1669 = vst.msk [vmem:[#allocation10] sm:$0xff] %vm116_vm0, %v1667_v26  ;;  %v1668_v29 = vadd.f32 %v1664_v27, %v2592_v7 }
 0xa98   :  { %1670 = vst.msk [vmem:[#allocation10 + $0x8] sm:$0xff] %vm116_vm0, %v1668_v29 }
 0xa99   :  { %2152 = shalt.err (!%p2149_p8)
}
 0xa9a   :  { %s2153_s14 = scalar_lea.hbm %s2688_s18, 256 }
 0xa9b   :  { %p2154_p9 = scmp.ne.s32.totalorder %s2688_s18, %s2153_s14  ;;  %p2157_p10 = scmp.lt.u32.totalorder %s2153_s14, %s2688_s18 }
 0xa9d   :  { %p2159_p11 = pnand %p2157_p10, %p2154_p9 }
 0xa9f   :  { %2162 = shalt.err (!%p2159_p11)
}
 0xaa0   :  { %s2185_s30 = smov 128  }
 0xaa1   :  { %1682 = dma.vmem_to_hbm [thread:$0]  %s1677_s11, 256, %s2688_s18, [#allocation4], %s2185_s30, %s2185_s30, %s2182_s29  }
 0xaa2   :  { %2169 = dma.done.wait [#allocation4], 256  }
 0xaa3   :  { %2170 = vsyncadd [#allocation4], 4294967040 }
 0xaa4   :  { %1686 = vsyncpa [#allocation3], 1 }
 0xaa5   :  { %1687 = vsyncpa [#allocation6], 1 }
 0xaa6   :  { %1688 = vsyncpa [#allocation9], 1 }
 0xaa7   :  { %1689 = vsyncpa [#allocation4], 1 }

</bundles_post_ra>
